<compile_context>
chip_gen: v6e
topology: v6e:2x2x1
jax: 0.10.0
libtpu: 0.0.40
codegen_flags: <defaults>
</compile_context>

<pallas_src>
import jax
import jax.numpy as jnp
from jax.experimental import pallas as pl
from jax.experimental.pallas import tpu as pltpu

# ----------------------------------------------------------------------------
# Small (TPU-friendly) stand-ins for the Config sizes.
# ----------------------------------------------------------------------------
TEXT_EMBED_SIZE = 256      # Config.TEXT_EMBED_SIZE   (768 in the original)
TEXT_PROJECT_SIZE = 512    # Config.TEXT_PROJECT_SIZE (2048)
IMAGE_FEATURE_SIZE = 512   # image_feature_size       (2048) -- must equal TEXT_PROJECT_SIZE
HIDDEN_SIZE_1 = 512        # Config.HIDDEN_SIZE_1     (2048)
HIDDEN_SIZE_2 = 256        # Config.HIDDEN_SIZE_2     (1024)
NUM_CLASSES = 128          # len(Config.OUTPUT_CLASSES)
LEAKY_SLOPE = 0.01         # nn.LeakyReLU() default negative_slope
MAX_BATCH_TILE = 1024      # upper bound; actual tile is VMEM/batch derived

C_PAD = ((NUM_CLASSES + 127) // 128) * 128   # lane-dense class dim


def _round_up(x, m):
    return ((x + m - 1) // m) * m


def _physical_vmem_bytes():
    # Trace-time hardware query; conservative v7x fallback if unavailable.
    try:
        info = pltpu.get_tpu_info()
        return int(getattr(info, "vmem_capacity_bytes", 64 << 20))
    except Exception:  # pragma: no cover - defensive
        return 64 << 20


# ----------------------------------------------------------------------------
# Pallas kernel: fused VQA head
# bf16 MXU operands, f32 accumulation, f32 elementwise, bf16 writeback.
# ----------------------------------------------------------------------------
def _vqa_head_kernel(text_ref, img_ref,
                     wt_ref, bt_ref,
                     w1_ref, b1_ref,
                     w2_ref, b2_ref,
                     w3_ref, b3_ref,
                     out_ref):
    bf16 = jnp.bfloat16

    # text_projection: (TB, E) @ (E, P) + (1, P)   (bf16 in, f32 acc)
    tp = jnp.dot(text_ref[...], wt_ref[...],
                 preferred_element_type=jnp.float32) + bt_ref[...]

    # combined_features = text_proj * image_features  (f32 VPU elementwise)
    comb = tp * img_ref[...].astype(jnp.float32)

    # dropout: identity (eval-mode semantics, deterministic)
    # TODO(synk): training-mode dropout (rate 0.3) not implemented; eval identity.

    # fc1 + LeakyReLU (single VPU max)
    h1 = jnp.dot(comb.astype(bf16), w1_ref[...],
                 preferred_element_type=jnp.float32) + b1_ref[...]
    h1 = jnp.maximum(h1, LEAKY_SLOPE * h1)

    # fc2
    h2 = jnp.dot(h1.astype(bf16), w2_ref[...],
                 preferred_element_type=jnp.float32) + b2_ref[...]

    # fc3 -> logits (lane-padded class dim), bf16 writeback
    logits = jnp.dot(h2.astype(bf16), w3_ref[...],
                     preferred_element_type=jnp.float32) + b3_ref[...]
    out_ref[...] = logits.astype(out_ref.dtype)


# ----------------------------------------------------------------------------
# Tiling / VMEM budgeting helpers
# ----------------------------------------------------------------------------
def _per_row_vmem_bytes():
    # bf16 input/output tiles, double-buffered by the pipeline
    io = 2 * 2 * (TEXT_EMBED_SIZE + IMAGE_FEATURE_SIZE + C_PAD)
    # f32 intermediates live in VMEM/vregs (conservative: all concurrently)
    inter = 4 * (TEXT_PROJECT_SIZE + IMAGE_FEATURE_SIZE
                 + HIDDEN_SIZE_1 + HIDDEN_SIZE_2 + C_PAD)
    return io + inter


def _weight_vmem_bytes():
    # bf16 weights + f32 biases; assume double-buffered (conservative).
    w = 2 * (TEXT_EMBED_SIZE * TEXT_PROJECT_SIZE
             + IMAGE_FEATURE_SIZE * HIDDEN_SIZE_1
             + HIDDEN_SIZE_1 * HIDDEN_SIZE_2
             + HIDDEN_SIZE_2 * C_PAD)
    b = 4 * (TEXT_PROJECT_SIZE + HIDDEN_SIZE_1 + HIDDEN_SIZE_2 + C_PAD)
    return 2 * (w + b)


def _choose_batch_tile(B, phys_vmem):
    """Largest power-of-two tile that fits a conservative VMEM budget and keeps
    batch-padding waste small (< ~12.5%)."""
    per_row = _per_row_vmem_bytes()
    budget = int(0.6 * phys_vmem) - _weight_vmem_bytes() - (8 << 20)
    budget_rows = max(8, budget // per_row)
    b8 = _round_up(max(B, 1), 8)
    tb = 8
    for cand in (16, 32, 64, 128, 256, 512, 1024):
        if cand > MAX_BATCH_TILE or cand > budget_rows or cand > b8:
            break
        padded = _round_up(b8, cand)
        if padded - b8 <= max(cand // 8, padded // 8):
            tb = cand
    return tb


# ----------------------------------------------------------------------------
# Pallas wrapper: batch-tiled grid, weights resident, lane-dense bf16 output
# ----------------------------------------------------------------------------
def vqa_head(text_features, image_features, params):
    if TEXT_PROJECT_SIZE != IMAGE_FEATURE_SIZE:
        raise ValueError(
            "elementwise fusion requires TEXT_PROJECT_SIZE == IMAGE_FEATURE_SIZE "
            f"(got {TEXT_PROJECT_SIZE} vs {IMAGE_FEATURE_SIZE})")

    B, E = text_features.shape
    assert E == TEXT_EMBED_SIZE
    assert image_features.shape == (B, IMAGE_FEATURE_SIZE)
    assert params["w3"].shape == (HIDDEN_SIZE_2, C_PAD)   # padded at init time

    phys_vmem = _physical_vmem_bytes()
    tb = _choose_batch_tile(B, phys_vmem)
    B_pad = _round_up(max(B, 8), tb)
    grid = (B_pad // tb,)

    # bf16 activation streams (halves the dominant HBM traffic)
    txt = text_features.astype(jnp.bfloat16)
    img = image_features.astype(jnp.bfloat16)
    if B_pad != B:
        txt = jnp.pad(txt, ((0, B_pad - B), (0, 0)))
        img = jnp.pad(img, ((0, B_pad - B), (0, 0)))

    args = (txt, img,
            params["wt"], params["bt"],
            params["w1"], params["b1"],
            params["w2"], params["b2"],
            params["w3"], params["b3"])

    def resident(arr):  # full block, constant index_map -> DMA'd once
        # TODO(synk): pipeline_mode=pl.Buffered(1) would halve resident-weight
        #             VMEM at real (2048-dim) sizes; left at default buffering.
        return pl.BlockSpec(arr.shape, lambda i: (0, 0))

    in_specs = [
        pl.BlockSpec((tb, TEXT_EMBED_SIZE), lambda i: (i, 0)),
        pl.BlockSpec((tb, IMAGE_FEATURE_SIZE), lambda i: (i, 0)),
        resident(params["wt"]), resident(params["bt"]),
        resident(params["w1"]), resident(params["b1"]),
        resident(params["w2"]), resident(params["b2"]),
        resident(params["w3"]), resident(params["b3"]),
    ]
    out_specs = pl.BlockSpec((tb, C_PAD), lambda i: (i, 0))

    # advisory cost estimate (real bf16 traffic) so XLA schedules against glue
    flops = 2 * B_pad * (TEXT_EMBED_SIZE * TEXT_PROJECT_SIZE
                         + IMAGE_FEATURE_SIZE * HIDDEN_SIZE_1
                         + HIDDEN_SIZE_1 * HIDDEN_SIZE_2
                         + HIDDEN_SIZE_2 * C_PAD)
    in_bytes = sum(int(a.size) * a.dtype.itemsize for a in args)
    out_bytes = B_pad * C_PAD * 2
    cost = pl.CostEstimate(flops=int(flops), transcendentals=0,
                           bytes_accessed=int(in_bytes + out_bytes))

    # VMEM budget: resident weights + per-tile activation/output bytes only
    needed = _weight_vmem_bytes() + tb * _per_row_vmem_bytes() + (8 << 20)
    cap = min(int(0.8 * phys_vmem), 100 << 20)
    vmem_limit = int(min(max(needed, 32 << 20), cap))

    out = pl.pallas_call(
        _vqa_head_kernel,
        out_shape=jax.ShapeDtypeStruct((B_pad, C_PAD), jnp.bfloat16),
        grid=grid,
        in_specs=in_specs,
        out_specs=out_specs,
        compiler_params=pltpu.CompilerParams(
            dimension_semantics=("parallel",),   # batch steps shard across TCs
            vmem_limit_bytes=vmem_limit),
        cost_estimate=cost,
    )(*args)

    # slice off batch / class padding, upcast for downstream consumers
    return out[:B, :NUM_CLASSES].astype(jnp.float32)


# ----------------------------------------------------------------------------
# Deterministic parameter init (shapes follow the nn.Linear layers in __init__)
# Weights are pre-transposed (in_features, out_features), stored in bf16;
# biases stay f32 (added after the f32 accumulate).  w3/b3 are lane-padded
# once here (hoisted out of the hot path).
# ----------------------------------------------------------------------------
def init_params(key):
    ks = jax.random.split(key, 8)

    def lin(kw, kb, fan_in, fan_out):
        bound = 1.0 / jnp.sqrt(fan_in)
        w = jax.random.uniform(kw, (fan_in, fan_out), jnp.float32, -bound, bound)
        b = jax.random.uniform(kb, (1, fan_out), jnp.float32, -bound, bound)
        return w, b

    wt, bt = lin(ks[0], ks[1], TEXT_EMBED_SIZE, TEXT_PROJECT_SIZE)   # text_projection
    w1, b1 = lin(ks[2], ks[3], IMAGE_FEATURE_SIZE, HIDDEN_SIZE_1)    # fc1
    w2, b2 = lin(ks[4], ks[5], HIDDEN_SIZE_1, HIDDEN_SIZE_2)         # fc2
    w3, b3 = lin(ks[6], ks[7], HIDDEN_SIZE_2, NUM_CLASSES)           # fc3

    if C_PAD != NUM_CLASSES:   # one-time lane padding of the class dim
        w3 = jnp.pad(w3, ((0, 0), (0, C_PAD - NUM_CLASSES)))
        b3 = jnp.pad(b3, ((0, 0), (0, C_PAD - NUM_CLASSES)))

    bf16 = jnp.bfloat16
    return dict(wt=wt.astype(bf16), bt=bt,
                w1=w1.astype(bf16), b1=b1,
                w2=w2.astype(bf16), b2=b2,
                w3=w3.astype(bf16), b3=b3)


# ----------------------------------------------------------------------------
# Frozen backbone stubs (plain-JAX glue, torch.no_grad() region in the original)
# ----------------------------------------------------------------------------
# TODO(synk): resnet50 backbone not reproduced; replaced by global-avg-pool +
#             deterministic projection to IMAGE_FEATURE_SIZE.
def image_backbone_stub(images_nchw, proj):
    pooled = jnp.mean(images_nchw, axis=(2, 3))          # (B, C)  ~ avgpool.squeeze
    return pooled @ proj                                  # (B, IMAGE_FEATURE_SIZE)


# TODO(synk): BERT pooler_output not reproduced; replaced by deterministic
#             embedding lookup + mean pool over tokens.
def text_backbone_stub(token_ids, embed_table):
    emb = embed_table[token_ids]                          # (B, T, E)
    return jnp.mean(emb, axis=1)                          # (B, TEXT_EMBED_SIZE)


# ----------------------------------------------------------------------------
# Full forward (glue + Pallas head)
# ----------------------------------------------------------------------------
@jax.jit
def vqa_forward(images, token_ids, params, img_proj, embed_table):
    image_features = image_backbone_stub(images, img_proj)
    text_features = text_backbone_stub(token_ids, embed_table)
    return vqa_head(text_features, image_features, params)


# ----------------------------------------------------------------------------
# Pure-JAX reference of the head (mirrors the kernel's bf16 streams / f32 acc)
# ----------------------------------------------------------------------------
def vqa_head_ref(text_features, image_features, p):
    bf16 = jnp.bfloat16
    txt = text_features.astype(bf16)
    img = image_features.astype(bf16)
    tp = jnp.dot(txt, p["wt"], preferred_element_type=jnp.float32) + p["bt"]
    comb = tp * img.astype(jnp.float32)
    h1 = jnp.dot(comb.astype(bf16), p["w1"], preferred_element_type=jnp.float32) + p["b1"]
    h1 = jnp.maximum(h1, LEAKY_SLOPE * h1)
    h2 = jnp.dot(h1.astype(bf16), p["w2"], preferred_element_type=jnp.float32) + p["b2"]
    logits = jnp.dot(h2.astype(bf16), p["w3"], preferred_element_type=jnp.float32) + p["b3"]
    return logits[:, :NUM_CLASSES].astype(bf16).astype(jnp.float32)


if __name__ == "__main__":
    key = jax.random.PRNGKey(0)
    k_img, k_tok, k_par, k_proj, k_emb = jax.random.split(key, 5)

    B, C, H, W = 8, 3, 16, 16          # small NCHW images
    T, VOCAB = 8, 64                   # short token sequences

    images = jax.random.normal(k_img, (B, C, H, W), jnp.float32)
    token_ids = jax.random.randint(k_tok, (B, T), 0, VOCAB)

    params = init_params(k_par)
    img_proj = jax.random.normal(k_proj, (C, IMAGE_FEATURE_SIZE), jnp.float32) * 0.1
    embed_table = jax.random.normal(k_emb, (VOCAB, TEXT_EMBED_SIZE), jnp.float32) * 0.1

    logits = vqa_forward(images, token_ids, params, img_proj, embed_table)
    logits = jax.block_until_ready(logits)
    assert logits.shape == (B, NUM_CLASSES)

    # correctness check of the Pallas head against the bf16-matched JAX reference
    img_feat = image_backbone_stub(images, img_proj)
    txt_feat = text_backbone_stub(token_ids, embed_table)
    ref = vqa_head_ref(txt_feat, img_feat, params)
    assert jnp.allclose(logits, ref, atol=2e-2, rtol=2e-2), \
        float(jnp.max(jnp.abs(logits - ref)))

    print("KERNEL_OK")
</pallas_src>

<mosaic_0001>
module attributes {stable_mosaic.version = 11 : i64} {
  func.func @_vqa_head_kernel(%arg0: i32, %arg1: memref<8x256xbf16, #tpu.memory_space<vmem>>, %arg2: memref<8x512xbf16, #tpu.memory_space<vmem>>, %arg3: memref<256x512xbf16, #tpu.memory_space<vmem>>, %arg4: memref<1x512xf32, #tpu.memory_space<vmem>>, %arg5: memref<512x512xbf16, #tpu.memory_space<vmem>>, %arg6: memref<1x512xf32, #tpu.memory_space<vmem>>, %arg7: memref<512x256xbf16, #tpu.memory_space<vmem>>, %arg8: memref<1x256xf32, #tpu.memory_space<vmem>>, %arg9: memref<256x128xbf16, #tpu.memory_space<vmem>>, %arg10: memref<1x128xf32, #tpu.memory_space<vmem>>, %arg11: memref<8x128xbf16, #tpu.memory_space<vmem>>) attributes {dimension_semantics = [#tpu.dimension_semantics<parallel>], iteration_bounds = array<i64: 1>, scalar_prefetch = 0 : i64, scratch_operands = 0 : i64, tpu.core_type = #tpu.core_type<tc>, window_params = [{transform_indices = @transform_0, window_bounds = array<i64: 8, 256>}, {transform_indices = @transform_1, window_bounds = array<i64: 8, 512>}, {pipeline_mode = #tpu.pipeline_mode<synchronous>, transform_indices = @transform_2, window_bounds = array<i64: 256, 512>}, {pipeline_mode = #tpu.pipeline_mode<synchronous>, transform_indices = @transform_3, window_bounds = array<i64: 1, 512>}, {pipeline_mode = #tpu.pipeline_mode<synchronous>, transform_indices = @transform_4, window_bounds = array<i64: 512, 512>}, {pipeline_mode = #tpu.pipeline_mode<synchronous>, transform_indices = @transform_5, window_bounds = array<i64: 1, 512>}, {pipeline_mode = #tpu.pipeline_mode<synchronous>, transform_indices = @transform_6, window_bounds = array<i64: 512, 256>}, {pipeline_mode = #tpu.pipeline_mode<synchronous>, transform_indices = @transform_7, window_bounds = array<i64: 1, 256>}, {pipeline_mode = #tpu.pipeline_mode<synchronous>, transform_indices = @transform_8, window_bounds = array<i64: 256, 128>}, {pipeline_mode = #tpu.pipeline_mode<synchronous>, transform_indices = @transform_9, window_bounds = array<i64: 1, 128>}, {transform_indices = @transform_10, window_bounds = array<i64: 8, 128>}]} {
    %c0 = arith.constant 0 : index
    %c0_0 = arith.constant 0 : index
    %0 = vector.load %arg1[%c0, %c0_0] : memref<8x256xbf16, #tpu.memory_space<vmem>>, vector<8x256xbf16>
    %c0_1 = arith.constant 0 : index
    %c0_2 = arith.constant 0 : index
    %1 = vector.load %arg3[%c0_1, %c0_2] : memref<256x512xbf16, #tpu.memory_space<vmem>>, vector<256x512xbf16>
    %cst = arith.constant dense<0.000000e+00> : vector<8x512xf32>
    %2 = tpu.matmul %0, %1, %cst {dimension_numbers = #tpu.dot_dimension_numbers<[1], [0], [0], [1], [0, 0, 1, 1], [], []>} : vector<8x256xbf16>, vector<256x512xbf16>, vector<8x512xf32> -> vector<8x512xf32>
    %c0_3 = arith.constant 0 : index
    %c0_4 = arith.constant 0 : index
    %3 = vector.load %arg4[%c0_3, %c0_4] : memref<1x512xf32, #tpu.memory_space<vmem>>, vector<1x512xf32>
    %4 = vector.broadcast %3 : vector<1x512xf32> to vector<8x512xf32>
    %5 = arith.addf %2, %4 : vector<8x512xf32>
    %c0_5 = arith.constant 0 : index
    %c0_6 = arith.constant 0 : index
    %6 = vector.load %arg2[%c0_5, %c0_6] : memref<8x512xbf16, #tpu.memory_space<vmem>>, vector<8x512xbf16>
    %7 = arith.extf %6 : vector<8x512xbf16> to vector<8x512xf32>
    %8 = arith.mulf %5, %7 : vector<8x512xf32>
    %9 = arith.truncf %8 : vector<8x512xf32> to vector<8x512xbf16>
    %c0_7 = arith.constant 0 : index
    %c0_8 = arith.constant 0 : index
    %10 = vector.load %arg5[%c0_7, %c0_8] : memref<512x512xbf16, #tpu.memory_space<vmem>>, vector<512x512xbf16>
    %cst_9 = arith.constant dense<0.000000e+00> : vector<8x512xf32>
    %11 = tpu.matmul %9, %10, %cst_9 {dimension_numbers = #tpu.dot_dimension_numbers<[1], [0], [0], [1], [0, 0, 1, 1], [], []>} : vector<8x512xbf16>, vector<512x512xbf16>, vector<8x512xf32> -> vector<8x512xf32>
    %c0_10 = arith.constant 0 : index
    %c0_11 = arith.constant 0 : index
    %12 = vector.load %arg6[%c0_10, %c0_11] : memref<1x512xf32, #tpu.memory_space<vmem>>, vector<1x512xf32>
    %13 = vector.broadcast %12 : vector<1x512xf32> to vector<8x512xf32>
    %14 = arith.addf %11, %13 : vector<8x512xf32>
    %cst_12 = arith.constant 0.00999999977 : f32
    %15 = vector.broadcast %cst_12 : f32 to vector<8x512xf32>
    %16 = arith.mulf %15, %14 : vector<8x512xf32>
    %17 = arith.maximumf %14, %16 : vector<8x512xf32>
    %18 = arith.truncf %17 : vector<8x512xf32> to vector<8x512xbf16>
    %c0_13 = arith.constant 0 : index
    %c0_14 = arith.constant 0 : index
    %19 = vector.load %arg7[%c0_13, %c0_14] : memref<512x256xbf16, #tpu.memory_space<vmem>>, vector<512x256xbf16>
    %cst_15 = arith.constant dense<0.000000e+00> : vector<8x256xf32>
    %20 = tpu.matmul %18, %19, %cst_15 {dimension_numbers = #tpu.dot_dimension_numbers<[1], [0], [0], [1], [0, 0, 1, 1], [], []>} : vector<8x512xbf16>, vector<512x256xbf16>, vector<8x256xf32> -> vector<8x256xf32>
    %c0_16 = arith.constant 0 : index
    %c0_17 = arith.constant 0 : index
    %21 = vector.load %arg8[%c0_16, %c0_17] : memref<1x256xf32, #tpu.memory_space<vmem>>, vector<1x256xf32>
    %22 = vector.broadcast %21 : vector<1x256xf32> to vector<8x256xf32>
    %23 = arith.addf %20, %22 : vector<8x256xf32>
    %24 = arith.truncf %23 : vector<8x256xf32> to vector<8x256xbf16>
    %c0_18 = arith.constant 0 : index
    %c0_19 = arith.constant 0 : index
    %25 = vector.load %arg9[%c0_18, %c0_19] : memref<256x128xbf16, #tpu.memory_space<vmem>>, vector<256x128xbf16>
    %cst_20 = arith.constant dense<0.000000e+00> : vector<8x128xf32>
    %26 = tpu.matmul %24, %25, %cst_20 {dimension_numbers = #tpu.dot_dimension_numbers<[1], [0], [0], [1], [0, 0, 1, 1], [], []>} : vector<8x256xbf16>, vector<256x128xbf16>, vector<8x128xf32> -> vector<8x128xf32>
    %c0_21 = arith.constant 0 : index
    %c0_22 = arith.constant 0 : index
    %27 = vector.load %arg10[%c0_21, %c0_22] : memref<1x128xf32, #tpu.memory_space<vmem>>, vector<1x128xf32>
    %28 = vector.broadcast %27 : vector<1x128xf32> to vector<8x128xf32>
    %29 = arith.addf %26, %28 : vector<8x128xf32>
    %30 = arith.truncf %29 : vector<8x128xf32> to vector<8x128xbf16>
    %c0_23 = arith.constant 0 : index
    %c0_24 = arith.constant 0 : index
    %31 = vector.load %arg11[%c0_23, %c0_24] : memref<8x128xbf16, #tpu.memory_space<vmem>>, vector<8x128xbf16>
    tpu.vector_store %arg11[%c0_23, %c0_24], %30 {strides = array<i32>} : memref<8x128xbf16, #tpu.memory_space<vmem>>, vector<8x128xbf16>,
    return
  }
  func.func @transform_0(%arg0: i32) -> (i32, i32) {
    %c0_i32 = arith.constant 0 : i32
    %c0_i32_0 = arith.constant 0 : i32
    return %arg0, %c0_i32 : i32, i32
  }
  func.func @transform_1(%arg0: i32) -> (i32, i32) {
    %c0_i32 = arith.constant 0 : i32
    %c0_i32_0 = arith.constant 0 : i32
    return %arg0, %c0_i32 : i32, i32
  }
  func.func @transform_2(%arg0: i32) -> (i32, i32) {
    %c0_i32 = arith.constant 0 : i32
    %c0_i32_0 = arith.constant 0 : i32
    %c0_i32_1 = arith.constant 0 : i32
    return %c0_i32, %c0_i32_0 : i32, i32
  }
  func.func @transform_3(%arg0: i32) -> (i32, i32) {
    %c0_i32 = arith.constant 0 : i32
    %c0_i32_0 = arith.constant 0 : i32
    %c0_i32_1 = arith.constant 0 : i32
    return %c0_i32, %c0_i32_0 : i32, i32
  }
  func.func @transform_4(%arg0: i32) -> (i32, i32) {
    %c0_i32 = arith.constant 0 : i32
    %c0_i32_0 = arith.constant 0 : i32
    %c0_i32_1 = arith.constant 0 : i32
    return %c0_i32, %c0_i32_0 : i32, i32
  }
  func.func @transform_5(%arg0: i32) -> (i32, i32) {
    %c0_i32 = arith.constant 0 : i32
    %c0_i32_0 = arith.constant 0 : i32
    %c0_i32_1 = arith.constant 0 : i32
    return %c0_i32, %c0_i32_0 : i32, i32
  }
  func.func @transform_6(%arg0: i32) -> (i32, i32) {
    %c0_i32 = arith.constant 0 : i32
    %c0_i32_0 = arith.constant 0 : i32
    %c0_i32_1 = arith.constant 0 : i32
    return %c0_i32, %c0_i32_0 : i32, i32
  }
  func.func @transform_7(%arg0: i32) -> (i32, i32) {
    %c0_i32 = arith.constant 0 : i32
    %c0_i32_0 = arith.constant 0 : i32
    %c0_i32_1 = arith.constant 0 : i32
    return %c0_i32, %c0_i32_0 : i32, i32
  }
  func.func @transform_8(%arg0: i32) -> (i32, i32) {
    %c0_i32 = arith.constant 0 : i32
    %c0_i32_0 = arith.constant 0 : i32
    %c0_i32_1 = arith.constant 0 : i32
    return %c0_i32, %c0_i32_0 : i32, i32
  }
  func.func @transform_9(%arg0: i32) -> (i32, i32) {
    %c0_i32 = arith.constant 0 : i32
    %c0_i32_0 = arith.constant 0 : i32
    %c0_i32_1 = arith.constant 0 : i32
    return %c0_i32, %c0_i32_0 : i32, i32
  }
  func.func @transform_10(%arg0: i32) -> (i32, i32) {
    %c0_i32 = arith.constant 0 : i32
    %c0_i32_0 = arith.constant 0 : i32
    return %arg0, %c0_i32 : i32, i32
  }
}

</mosaic_0001>

<bundles_post_ra>
// kernel: vqa_forward.1
= control target key start
LH: loop header
LB: loop body
LE: loop exit
PB: predicated region body
PF: predicated region fallthrough
CT: control target
= control target key end

     0   :  { %15 = vsyncpa [#allocation3], 0  ;;  %s2912_s13 = smov [#allocation2]   ;;  %s3653_s0 = inlined_call_operand.vmem [shape: bf16[8,256], index: 0, kind: input, shape index: {}]   ;;  %s3654_s1 = inlined_call_operand.vmem [shape: bf16[8,512], index: 1, kind: input, shape index: {}]   ;;  %s3655_s2 = inlined_call_operand.vmem [shape: bf16[256,512], index: 2, kind: input, shape index: {}]   ;;  %s3656_s3 = inlined_call_operand.vmem [shape: f32[1,512], index: 3, kind: input, shape index: {}]   ;;  %s3657_s4 = inlined_call_operand.vmem [shape: bf16[512,512], index: 4, kind: input, shape index: {}]   ;;  %s3658_s5 = inlined_call_operand.vmem [shape: f32[1,512], index: 5, kind: input, shape index: {}]   ;;  %s3659_s6 = inlined_call_operand.hbm [shape: bf16[512,256], index: 6, kind: input, shape index: {}]   ;;  %s3660_s7 = inlined_call_operand.vmem [shape: f32[1,256], index: 7, kind: input, shape index: {}]   ;;  %s3661_s8 = inlined_call_operand.vmem [shape: bf16[256,128], index: 8, kind: input, shape index: {}]   ;;  %s3662_s9 = inlined_call_operand.vmem [shape: f32[1,128], index: 9, kind: input, shape index: {}]   ;;  %s3663_s10 = inlined_call_operand.vmem [shape: bf16[8,128], index: 10, kind: output, shape index: {}]  }
   0x1   :  { %s33_s14 = sshll.u32 %s2912_s13, 4  ;;  %s34_s14 = int_to_ptr.vmem [resolvable:$true] %s33_s14 }
   0x2   :  { %s2898_s15 = scalar_lea.vmem %s34_s14, 8192  ;;  %p2903_p1 = scmp.lt.s32.totalorder %s34_s14, %s34_s14 }
   0x3   :  { %p2899_p0 = scmp.ne.s32.totalorder %s34_s14, %s2898_s15  ;;  %p2904_p2 = scmp.lt.s32.totalorder %s2898_s15, %s2898_s15 }
   0x5   :  { %p2905_p3 = por %p2904_p2, %p2903_p1 }
   0x7   :  { %p2906_p4 = pnand %p2905_p3, %p2899_p0 }
   0x9   :  { %2909 = shalt.err (!%p2906_p4)
}
   0xa   :  { %s2913_s16 = smov 128   ;;  %s2914_s17 = smov 8  }
   0xb   :  { %39 = dma.hbm_to_vmem [thread:$0]  %s3659_s6, 8192, %s34_s14, [#allocation3], %s2913_s16, %s2913_s16, %s2914_s17  }
   0xc   :  { %2910 = dma.done.wait [#allocation3], 8192  }
   0xd   :  { %2911 = vsyncadd [#allocation3], 4294959104  ;;  %v2488_v0 = vld [vmem:[%s3655_s2 + $0xe4] ss:$16 sps:$4 sm:$0xff]   ;;  %v2490_v1 = vld [vmem:[%s3655_s2 + $0xec] ss:$16 sps:$4 sm:$0xff]  }
   0xe   :  { %464 = vmatprep.subr.bf16.mxu0 %v2488_v0  ;;  %v2492_v2 = vld [vmem:[%s3655_s2 + $0xe0] ss:$16 sps:$4 sm:$0xff]   ;;  %v2493_v3 = vld [vmem:[%s3655_s2 + $0xe8] ss:$16 sps:$4 sm:$0xff]   ;;  %505 = vmatprep.subr.bf16.mxu1 %v2490_v1  ;;  %v2494_v4 = vld [vmem:[%s3655_s2 + $0xc4] ss:$16 sps:$4 sm:$0xff]  }
   0xf   :  { %465 = vmatpush1.bf16.msra.mxu0 %v2492_v2  ;;  %506 = vmatpush1.bf16.msra.mxu1 %v2493_v3  ;;  %v2496_v5 = vld [vmem:[%s3655_s2 + $0xcc] ss:$16 sps:$4 sm:$0xff]   ;;  %v2498_v6 = vld [vmem:[%s3655_s2 + $0xc0] ss:$16 sps:$4 sm:$0xff]   ;;  %v2499_v7 = vld [vmem:[%s3655_s2 + $0xc8] ss:$16 sps:$4 sm:$0xff]  }
  0x10   :  { %466 = vmatprep.subr.bf16.mxu0 %v2494_v4  ;;  %507 = vmatprep.subr.bf16.mxu1 %v2496_v5  ;;  %v2500_v8 = vld [vmem:[%s3655_s2 + $0xa4] ss:$16 sps:$4 sm:$0xff]   ;;  %v2502_v9 = vld [vmem:[%s3655_s2 + $0xac] ss:$16 sps:$4 sm:$0xff]   ;;  %v2504_v10 = vld [vmem:[%s3655_s2 + $0xa0] ss:$16 sps:$4 sm:$0xff]  }
  0x11   :  { %v2505_v11 = vld [vmem:[%s3655_s2 + $0xa8] ss:$16 sps:$4 sm:$0xff]   ;;  %v2506_v12 = vld [vmem:[%s3655_s2 + $0x84] ss:$16 sps:$4 sm:$0xff]   ;;  %v2508_v13 = vld [vmem:[%s3655_s2 + $0x8c] ss:$16 sps:$4 sm:$0xff]  }
  0x12   :  { %v2510_v14 = vld [vmem:[%s3655_s2 + $0x80] ss:$16 sps:$4 sm:$0xff]   ;;  %v2511_v15 = vld [vmem:[%s3655_s2 + $0x88] ss:$16 sps:$4 sm:$0xff]   ;;  %v2512_v16 = vld [vmem:[%s3655_s2 + $0x64] ss:$16 sps:$4 sm:$0xff]  }
  0x13   :  { %467 = vmatpush1.bf16.msra.mxu0 %v2498_v6  ;;  %508 = vmatpush1.bf16.msra.mxu1 %v2499_v7  ;;  %v2514_v17 = vld [vmem:[%s3655_s2 + $0x6c] ss:$16 sps:$4 sm:$0xff]   ;;  %v2516_v18 = vld [vmem:[%s3655_s2 + $0x60] ss:$16 sps:$4 sm:$0xff]   ;;  %v2517_v19 = vld [vmem:[%s3655_s2 + $0x68] ss:$16 sps:$4 sm:$0xff]  }
  0x14   :  { %468 = vmatprep.subr.bf16.mxu0 %v2500_v8  ;;  %509 = vmatprep.subr.bf16.mxu1 %v2502_v9  ;;  %v2518_v20 = vld [vmem:[%s3655_s2 + $0x44] ss:$16 sps:$4 sm:$0xff]   ;;  %v2520_v21 = vld [vmem:[%s3655_s2 + $0x4c] ss:$16 sps:$4 sm:$0xff]   ;;  %v2522_v22 = vld [vmem:[%s3655_s2 + $0x40] ss:$16 sps:$4 sm:$0xff]  }
  0x15   :  { %v2523_v23 = vld [vmem:[%s3655_s2 + $0x48] ss:$16 sps:$4 sm:$0xff]   ;;  %v2524_v24 = vld [vmem:[%s3655_s2 + $0x24] ss:$16 sps:$4 sm:$0xff]   ;;  %v2526_v25 = vld [vmem:[%s3655_s2 + $0x2c] ss:$16 sps:$4 sm:$0xff]  }
  0x16   :  { %v2528_v26 = vld [vmem:[%s3655_s2 + $0x20] ss:$16 sps:$4 sm:$0xff]   ;;  %v2529_v27 = vld [vmem:[%s3655_s2 + $0x28] ss:$16 sps:$4 sm:$0xff]   ;;  %v2530_v28 = vld [vmem:[%s3655_s2 + $0x4] ss:$16 sps:$4 sm:$0xff]  }
  0x17   :  { %469 = vmatpush1.bf16.msra.mxu0 %v2504_v10  ;;  %510 = vmatpush1.bf16.msra.mxu1 %v2505_v11  ;;  %v2532_v29 = vld [vmem:[%s3655_s2 + $0xc] ss:$16 sps:$4 sm:$0xff]   ;;  %v2534_v30 = vld [vmem:[%s3655_s2] ss:$16 sps:$4 sm:$0xff]   ;;  %v2535_v31 = vld [vmem:[%s3655_s2 + $0x8] ss:$16 sps:$4 sm:$0xff]  }
  0x18   :  { %470 = vmatprep.subr.bf16.mxu0 %v2506_v12  ;;  %511 = vmatprep.subr.bf16.mxu1 %v2508_v13  ;;  %v2536_v32 = vld [vmem:[%s3655_s2 + $0x1e4] ss:$16 sps:$4 sm:$0xff]   ;;  %v2538_v33 = vld [vmem:[%s3655_s2 + $0x1ec] ss:$16 sps:$4 sm:$0xff]   ;;  %v2540_v34 = vld [vmem:[%s3655_s2 + $0x1e0] ss:$16 sps:$4 sm:$0xff]  }
  0x19   :  { %v2541_v35 = vld [vmem:[%s3655_s2 + $0x1e8] ss:$16 sps:$4 sm:$0xff]   ;;  %v2542_v36 = vld [vmem:[%s3655_s2 + $0x1c4] ss:$16 sps:$4 sm:$0xff]   ;;  %v2544_v37 = vld [vmem:[%s3655_s2 + $0x1cc] ss:$16 sps:$4 sm:$0xff]  }
  0x1a   :  { %v2546_v38 = vld [vmem:[%s3655_s2 + $0x1c0] ss:$16 sps:$4 sm:$0xff]   ;;  %v2547_v39 = vld [vmem:[%s3655_s2 + $0x1c8] ss:$16 sps:$4 sm:$0xff]   ;;  %v2548_v40 = vld [vmem:[%s3655_s2 + $0x1a4] ss:$16 sps:$4 sm:$0xff]  }
  0x1b   :  { %471 = vmatpush1.bf16.msra.mxu0 %v2510_v14  ;;  %512 = vmatpush1.bf16.msra.mxu1 %v2511_v15  ;;  %v2550_v41 = vld [vmem:[%s3655_s2 + $0x1ac] ss:$16 sps:$4 sm:$0xff]   ;;  %v2552_v42 = vld [vmem:[%s3655_s2 + $0x1a0] ss:$16 sps:$4 sm:$0xff]   ;;  %v2553_v43 = vld [vmem:[%s3655_s2 + $0x1a8] ss:$16 sps:$4 sm:$0xff]  }
  0x1c   :  { %472 = vmatprep.subr.bf16.mxu0 %v2512_v16  ;;  %513 = vmatprep.subr.bf16.mxu1 %v2514_v17  ;;  %v2554_v44 = vld [vmem:[%s3655_s2 + $0x184] ss:$16 sps:$4 sm:$0xff]   ;;  %v2556_v45 = vld [vmem:[%s3655_s2 + $0x18c] ss:$16 sps:$4 sm:$0xff]   ;;  %v2558_v47 = vld [vmem:[%s3655_s2 + $0x180] ss:$16 sps:$4 sm:$0xff]  }
  0x1d   :  { %v50_v46 = vld [vmem:[%s3653_s0] sm:$0xff]  ;;  %v2559_v49 = vld [vmem:[%s3655_s2 + $0x188] ss:$16 sps:$4 sm:$0xff]   ;;  %v2562_v51 = vld [vmem:[%s3655_s2 + $0x16c] ss:$16 sps:$4 sm:$0xff]  }
  0x1e   :  { %v2189_v48 = vcombine.high %v50_v46, %v50_v46  ;;  %v2560_v50 = vld [vmem:[%s3655_s2 + $0x164] ss:$16 sps:$4 sm:$0xff]   ;;  %v2564_v52 = vld [vmem:[%s3655_s2 + $0x160] ss:$16 sps:$4 sm:$0xff]   ;;  %v2565_v53 = vld [vmem:[%s3655_s2 + $0x168] ss:$16 sps:$4 sm:$0xff]   ;;  %v2188_v4 = vcombine.low %v50_v46, %v50_v46 }
  0x1f   :  { %473 = vmatpush1.bf16.msra.mxu0 %v2516_v18  ;;  %514 = vmatpush1.bf16.msra.mxu1 %v2517_v19  ;;  %v2566_v54 = vld [vmem:[%s3655_s2 + $0x144] ss:$16 sps:$4 sm:$0xff]   ;;  %v2568_v55 = vld [vmem:[%s3655_s2 + $0x14c] ss:$16 sps:$4 sm:$0xff]   ;;  %v2570_v56 = vld [vmem:[%s3655_s2 + $0x140] ss:$16 sps:$4 sm:$0xff]  }
  0x20   :  { %474 = vmatprep.subr.bf16.mxu0 %v2518_v20  ;;  %515 = vmatprep.subr.bf16.mxu1 %v2520_v21  ;;  %v2571_v57 = vld [vmem:[%s3655_s2 + $0x148] ss:$16 sps:$4 sm:$0xff]   ;;  %v2572_v58 = vld [vmem:[%s3655_s2 + $0x124] ss:$16 sps:$4 sm:$0xff]   ;;  %v2574_v59 = vld [vmem:[%s3655_s2 + $0x12c] ss:$16 sps:$4 sm:$0xff]  }
  0x21   :  { %496 = vmatprep.mubr.bf16.mxu0 %v2189_v48  ;;  %537 = vmatprep.mubr.bf16.mxu1 %v2189_v48  ;;  %v2576_v60 = vld [vmem:[%s3655_s2 + $0x120] ss:$16 sps:$4 sm:$0xff]   ;;  %v2577_v61 = vld [vmem:[%s3655_s2 + $0x128] ss:$16 sps:$4 sm:$0xff]   ;;  %v2578_v62 = vld [vmem:[%s3655_s2 + $0x104] ss:$16 sps:$4 sm:$0xff]  }
  0x22   :  { %v2580_v63 = vld [vmem:[%s3655_s2 + $0x10c] ss:$16 sps:$4 sm:$0xff]   ;;  %v2582_v0 = vld [vmem:[%s3655_s2 + $0x100] ss:$16 sps:$4 sm:$0xff]   ;;  %v2583_v1 = vld [vmem:[%s3655_s2 + $0x108] ss:$16 sps:$4 sm:$0xff]  }
  0x23   :  { %475 = vmatpush1.bf16.msra.mxu0 %v2522_v22  ;;  %516 = vmatpush1.bf16.msra.mxu1 %v2523_v23  ;;  %v2588_v2 = vld [vmem:[%s3657_s4 + $0xe4] ss:$16 sps:$4 sm:$0xff]   ;;  %v2586_v5 = vld [vmem:[%s3657_s4 + $0xe0] ss:$16 sps:$4 sm:$0xff]  }
  0x24   :  { %476 = vmatprep.subr.bf16.mxu0 %v2524_v24  ;;  %517 = vmatprep.subr.bf16.mxu1 %v2526_v25  ;;  %v2591_v3 = vld [vmem:[%s3657_s4 + $0x2e4] ss:$16 sps:$4 sm:$0xff]   ;;  %v2589_v6 = vld [vmem:[%s3657_s4 + $0x2e0] ss:$16 sps:$4 sm:$0xff]  }
  0x25   :  { %v2594_v7 = vld [vmem:[%s3657_s4 + $0xc4] ss:$16 sps:$4 sm:$0xff]   ;;  %v2592_v9 = vld [vmem:[%s3657_s4 + $0xc0] ss:$16 sps:$4 sm:$0xff]  }
  0x26   :  { %v2597_v8 = vld [vmem:[%s3657_s4 + $0x2c4] ss:$16 sps:$4 sm:$0xff]   ;;  %v2595_v10 = vld [vmem:[%s3657_s4 + $0x2c0] ss:$16 sps:$4 sm:$0xff]  }
  0x27   :  { %477 = vmatpush1.bf16.msra.mxu0 %v2528_v26  ;;  %518 = vmatpush1.bf16.msra.mxu1 %v2529_v27  ;;  %v2600_v11 = vld [vmem:[%s3657_s4 + $0xa4] ss:$16 sps:$4 sm:$0xff]   ;;  %v2598_v13 = vld [vmem:[%s3657_s4 + $0xa0] ss:$16 sps:$4 sm:$0xff]  }
  0x28   :  { %478 = vmatprep.subr.bf16.mxu0 %v2530_v28  ;;  %519 = vmatprep.subr.bf16.mxu1 %v2532_v29  ;;  %v2603_v12 = vld [vmem:[%s3657_s4 + $0x2a4] ss:$16 sps:$4 sm:$0xff]   ;;  %v2601_v14 = vld [vmem:[%s3657_s4 + $0x2a0] ss:$16 sps:$4 sm:$0xff]  }
  0x29   :  { %v2606_v15 = vld [vmem:[%s3657_s4 + $0x84] ss:$16 sps:$4 sm:$0xff]   ;;  %v2604_v17 = vld [vmem:[%s3657_s4 + $0x80] ss:$16 sps:$4 sm:$0xff]  }
  0x2a   :  { %v2609_v16 = vld [vmem:[%s3657_s4 + $0x284] ss:$16 sps:$4 sm:$0xff]   ;;  %v2607_v18 = vld [vmem:[%s3657_s4 + $0x280] ss:$16 sps:$4 sm:$0xff]  }
  0x2b   :  { %479 = vmatpush1.bf16.msra.mxu0 %v2534_v30  ;;  %520 = vmatpush1.bf16.msra.mxu1 %v2535_v31  ;;  %v2612_v19 = vld [vmem:[%s3657_s4 + $0x64] ss:$16 sps:$4 sm:$0xff]   ;;  %v2610_v21 = vld [vmem:[%s3657_s4 + $0x60] ss:$16 sps:$4 sm:$0xff]  }
  0x2c   :  { %480 = vmatprep.subr.bf16.mxu0 %v2536_v32  ;;  %521 = vmatprep.subr.bf16.mxu1 %v2538_v33  ;;  %v2615_v20 = vld [vmem:[%s3657_s4 + $0x264] ss:$16 sps:$4 sm:$0xff]   ;;  %v2613_v22 = vld [vmem:[%s3657_s4 + $0x260] ss:$16 sps:$4 sm:$0xff]  }
  0x2d   :  { %v2618_v23 = vld [vmem:[%s3657_s4 + $0x44] ss:$16 sps:$4 sm:$0xff]   ;;  %v2616_v25 = vld [vmem:[%s3657_s4 + $0x40] ss:$16 sps:$4 sm:$0xff]  }
  0x2e   :  { %v2621_v24 = vld [vmem:[%s3657_s4 + $0x244] ss:$16 sps:$4 sm:$0xff]   ;;  %v2619_v26 = vld [vmem:[%s3657_s4 + $0x240] ss:$16 sps:$4 sm:$0xff]  }
  0x2f   :  { %481 = vmatpush2.bf16.msra.mxu0 %v2540_v34  ;;  %522 = vmatpush2.bf16.msra.mxu1 %v2541_v35  ;;  %v2624_v27 = vld [vmem:[%s3657_s4 + $0x24] ss:$16 sps:$4 sm:$0xff]   ;;  %v2622_v29 = vld [vmem:[%s3657_s4 + $0x20] ss:$16 sps:$4 sm:$0xff]  }
  0x30   :  { %482 = vmatprep.subr.bf16.mxu0 %v2542_v36  ;;  %523 = vmatprep.subr.bf16.mxu1 %v2544_v37  ;;  %v2627_v28 = vld [vmem:[%s3657_s4 + $0x224] ss:$16 sps:$4 sm:$0xff]   ;;  %v2625_v30 = vld [vmem:[%s3657_s4 + $0x220] ss:$16 sps:$4 sm:$0xff]  }
  0x31   :  { %v2630_v31 = vld [vmem:[%s3657_s4 + $0x4] ss:$16 sps:$4 sm:$0xff]   ;;  %v2628_v33 = vld [vmem:[%s3657_s4] ss:$16 sps:$4 sm:$0xff]  }
  0x32   :  { %v2633_v32 = vld [vmem:[%s3657_s4 + $0x204] ss:$16 sps:$4 sm:$0xff]   ;;  %v2631_v34 = vld [vmem:[%s3657_s4 + $0x200] ss:$16 sps:$4 sm:$0xff]  }
  0x33   :  { %483 = vmatpush2.bf16.msra.mxu0 %v2546_v38  ;;  %524 = vmatpush2.bf16.msra.mxu1 %v2547_v39  ;;  %v2636_v35 = vld [vmem:[%s3657_s4 + $0x1e4] ss:$16 sps:$4 sm:$0xff]   ;;  %v2634_v37 = vld [vmem:[%s3657_s4 + $0x1e0] ss:$16 sps:$4 sm:$0xff]  }
  0x34   :  { %484 = vmatprep.subr.bf16.mxu0 %v2548_v40  ;;  %525 = vmatprep.subr.bf16.mxu1 %v2550_v41  ;;  %v2639_v36 = vld [vmem:[%s3657_s4 + $0x3e4] ss:$16 sps:$4 sm:$0xff]   ;;  %v2637_v38 = vld [vmem:[%s3657_s4 + $0x3e0] ss:$16 sps:$4 sm:$0xff]  }
  0x35   :  { %v2642_v39 = vld [vmem:[%s3657_s4 + $0x1c4] ss:$16 sps:$4 sm:$0xff]   ;;  %v2640_v41 = vld [vmem:[%s3657_s4 + $0x1c0] ss:$16 sps:$4 sm:$0xff]  }
  0x36   :  { %v2645_v40 = vld [vmem:[%s3657_s4 + $0x3c4] ss:$16 sps:$4 sm:$0xff]   ;;  %v2649_v46 = vld [vmem:[%s3657_s4 + $0x3a0] ss:$16 sps:$4 sm:$0xff]  }
  0x37   :  { %485 = vmatpush2.bf16.msra.mxu0 %v2552_v42  ;;  %526 = vmatpush2.bf16.msra.mxu1 %v2553_v43  ;;  %v2643_v42 = vld [vmem:[%s3657_s4 + $0x3c0] ss:$16 sps:$4 sm:$0xff]   ;;  %v2648_v43 = vld [vmem:[%s3657_s4 + $0x1a4] ss:$16 sps:$4 sm:$0xff]  }
  0x38   :  { %486 = vmatprep.subr.bf16.mxu0 %v2554_v44  ;;  %527 = vmatprep.subr.bf16.mxu1 %v2556_v45  ;;  %v2651_v44 = vld [vmem:[%s3657_s4 + $0x3a4] ss:$16 sps:$4 sm:$0xff]   ;;  %v2646_v45 = vld [vmem:[%s3657_s4 + $0x1a0] ss:$16 sps:$4 sm:$0xff]  }
  0x39   :  { %v2657_v48 = vld [vmem:[%s3657_s4 + $0x384] ss:$16 sps:$4 sm:$0xff]  }
  0x3b   :  { %487 = vmatpush2.bf16.msra.mxu0 %v2558_v47  ;;  %528 = vmatpush2.bf16.msra.mxu1 %v2559_v49  ;;  %v2654_v47 = vld [vmem:[%s3657_s4 + $0x184] ss:$16 sps:$4 sm:$0xff]   ;;  %v2652_v49 = vld [vmem:[%s3657_s4 + $0x180] ss:$16 sps:$4 sm:$0xff]  }
  0x3c   :  { %488 = vmatprep.subr.bf16.mxu0 %v2560_v50  ;;  %529 = vmatprep.subr.bf16.mxu1 %v2562_v51  ;;  %v2655_v50 = vld [vmem:[%s3657_s4 + $0x380] ss:$16 sps:$4 sm:$0xff]   ;;  %v2660_v51 = vld [vmem:[%s3657_s4 + $0x164] ss:$16 sps:$4 sm:$0xff]  }
  0x3f   :  { %489 = vmatpush2.bf16.msra.mxu0 %v2564_v52  ;;  %530 = vmatpush2.bf16.msra.mxu1 %v2565_v53  ;;  %v2663_v52 = vld [vmem:[%s3657_s4 + $0x364] ss:$16 sps:$4 sm:$0xff]   ;;  %v2658_v53 = vld [vmem:[%s3657_s4 + $0x160] ss:$16 sps:$4 sm:$0xff]  }
  0x40   :  { %490 = vmatprep.subr.bf16.mxu0 %v2566_v54  ;;  %531 = vmatprep.subr.bf16.mxu1 %v2568_v55  ;;  %v2661_v54 = vld [vmem:[%s3657_s4 + $0x360] ss:$16 sps:$4 sm:$0xff]   ;;  %v2666_v55 = vld [vmem:[%s3657_s4 + $0x144] ss:$16 sps:$4 sm:$0xff]  }
  0x43   :  { %491 = vmatpush2.bf16.msra.mxu0 %v2570_v56  ;;  %532 = vmatpush2.bf16.msra.mxu1 %v2571_v57  ;;  %v2669_v56 = vld [vmem:[%s3657_s4 + $0x344] ss:$16 sps:$4 sm:$0xff]   ;;  %v2664_v57 = vld [vmem:[%s3657_s4 + $0x140] ss:$16 sps:$4 sm:$0xff]  }
  0x44   :  { %492 = vmatprep.subr.bf16.mxu0 %v2572_v58  ;;  %533 = vmatprep.subr.bf16.mxu1 %v2574_v59  ;;  %v2667_v58 = vld [vmem:[%s3657_s4 + $0x340] ss:$16 sps:$4 sm:$0xff]   ;;  %v2672_v59 = vld [vmem:[%s3657_s4 + $0x124] ss:$16 sps:$4 sm:$0xff]  }
  0x47   :  { %493 = vmatpush2.bf16.msra.mxu0 %v2576_v60  ;;  %534 = vmatpush2.bf16.msra.mxu1 %v2577_v61  ;;  %v2675_v60 = vld [vmem:[%s3657_s4 + $0x324] ss:$16 sps:$4 sm:$0xff]   ;;  %v2670_v61 = vld [vmem:[%s3657_s4 + $0x120] ss:$16 sps:$4 sm:$0xff]  }
  0x48   :  { %494 = vmatprep.subr.bf16.mxu0 %v2578_v62  ;;  %535 = vmatprep.subr.bf16.mxu1 %v2580_v63  ;;  %v2673_v62 = vld [vmem:[%s3657_s4 + $0x320] ss:$16 sps:$4 sm:$0xff]   ;;  %v2678_v63 = vld [vmem:[%s3657_s4 + $0x104] ss:$16 sps:$4 sm:$0xff]  }
  0x4b   :  { %495 = vmatpush2.bf16.msra.mxu0 %v2582_v0  ;;  %536 = vmatpush2.bf16.msra.mxu1 %v2583_v1  ;;  %v2681_v0 = vld [vmem:[%s3657_s4 + $0x304] ss:$16 sps:$4 sm:$0xff]   ;;  %v2676_v1 = vld [vmem:[%s3657_s4 + $0x100] ss:$16 sps:$4 sm:$0xff]  }
  0x4c   :  { %1350 = vmatprep.subr.bf16.mxu0 %v2588_v2  ;;  %1391 = vmatprep.subr.bf16.mxu1 %v2591_v3  ;;  %v2679_v2 = vld [vmem:[%s3657_s4 + $0x300] ss:$16 sps:$4 sm:$0xff]   ;;  %v2684_v3 = vld [vmem:[%s3657_s4 + $0xec] ss:$16 sps:$4 sm:$0xff]  }
  0x4e   :  { %497 = vmatmul.mubr.bf16.vlgmr.msra.gmra.mxu0 %v2188_v4  ;;  %538 = vmatmul.mubr.bf16.vlgmr.msra.gmra.mxu1 %v2188_v4  ;;  %v2687_v4 = vld [vmem:[%s3657_s4 + $0x2ec] ss:$16 sps:$4 sm:$0xff]  }
  0x4f   :  { %1351 = vmatpush1.bf16.msra.mxu0 %v2586_v5  ;;  %1392 = vmatpush1.bf16.msra.mxu1 %v2589_v6  ;;  %v117_v5 = vlaneseq }
  0x50   :  { %1352 = vmatprep.subr.bf16.mxu0 %v2594_v7  ;;  %1393 = vmatprep.subr.bf16.mxu1 %v2597_v8 }
  0x51   :  { %v3366_v6 = vshrl.u32 %v117_v5, 7  ;;  %v2729_v5 = vld [vmem:[%s3657_s4 + $0x20c] ss:$16 sps:$4 sm:$0xff]  }
  0x53   :  { %1353 = vmatpush1.bf16.msra.mxu0 %v2592_v9  ;;  %1394 = vmatpush1.bf16.msra.mxu1 %v2595_v10  ;;  %v3369_v7 = vsub.s32 0, %v3366_v6  ;;  %v127_v8 = vsub.s32 2, %v3366_v6  ;;  %v115_v9 = vld [vmem:[%s3656_s3] sm:$0xf]  ;;  %v3376_v10 = vsub.s32 1, %v3366_v6 }
  0x54   :  { %1354 = vmatprep.subr.bf16.mxu0 %v2600_v11  ;;  %1395 = vmatprep.subr.bf16.mxu1 %v2603_v12  ;;  %v131_v11 = vsub.s32 3, %v3366_v6  ;;  %v547_v12 = vld [vmem:[%s3654_s1 + $0x8] sm:$0xff]  ;;  %v2874_v6 = vld [vmem:[%s3661_s8 + $0x78] sm:$0xff]  }
  0x57   :  { %1355 = vmatpush1.bf16.msra.mxu0 %v2598_v13  ;;  %1396 = vmatpush1.bf16.msra.mxu1 %v2601_v14  ;;  %v120_v13 = vrot.slane %v115_v9, %v3369_v7  ;;  %v546_v14 = vld [vmem:[%s3654_s1] sm:$0xff] }
  0x58   :  { %1356 = vmatprep.subr.bf16.mxu0 %v2606_v15  ;;  %1397 = vmatprep.subr.bf16.mxu1 %v2609_v16  ;;  %v128_v15 = vrot.slane %v115_v9, %v127_v8  ;;  %v550_v16 = vunpack.c.l.bf16 %v547_v12 }
  0x5b   :  { %1357 = vmatpush1.bf16.msra.mxu0 %v2604_v17  ;;  %1398 = vmatpush1.bf16.msra.mxu1 %v2607_v18  ;;  %v124_v17 = vrot.slane %v115_v9, %v3376_v10  ;;  %v132_v18 = vrot.slane %v115_v9, %v131_v11  ;;  %v2724_v9 = vld [vmem:[%s3657_s4 + $0x8] ss:$16 sps:$4 sm:$0xff]  }
  0x5c   :  { %1358 = vmatprep.subr.bf16.mxu0 %v2612_v19  ;;  %1399 = vmatprep.subr.bf16.mxu1 %v2615_v20  ;;  %v548_v20 = vunpack.c.l.bf16 %v546_v14 }
  0x5f   :  { %1359 = vmatpush1.bf16.msra.mxu0 %v2610_v21  ;;  %1400 = vmatpush1.bf16.msra.mxu1 %v2613_v22 }
  0x60   :  { %1360 = vmatprep.subr.bf16.mxu0 %v2618_v23  ;;  %1401 = vmatprep.subr.bf16.mxu1 %v2621_v24  ;;  %v549_v24 = vunpack.c.h.bf16 %v546_v14  ;;  %v2735_v14 = vld [vmem:[%s3657_s4 + $0x3ec] ss:$16 sps:$4 sm:$0xff]  }
  0x63   :  { %1361 = vmatpush1.bf16.msra.mxu0 %v2616_v25  ;;  %1402 = vmatpush1.bf16.msra.mxu1 %v2619_v26  ;;  %v551_v25 = vunpack.c.h.bf16 %v547_v12  ;;  %v2727_v12 = vld [vmem:[%s3657_s4 + $0x208] ss:$16 sps:$4 sm:$0xff]  }
  0x64   :  { %1362 = vmatprep.subr.bf16.mxu0 %v2624_v27  ;;  %1403 = vmatprep.subr.bf16.mxu1 %v2627_v28 }
  0x67   :  { %1363 = vmatpush1.bf16.msra.mxu0 %v2622_v29  ;;  %1404 = vmatpush1.bf16.msra.mxu1 %v2625_v30 }
  0x68   :  { %1364 = vmatprep.subr.bf16.mxu0 %v2630_v31  ;;  %1405 = vmatprep.subr.bf16.mxu1 %v2633_v32 }
  0x6b   :  { %1365 = vmatpush1.bf16.msra.mxu0 %v2628_v33  ;;  %1406 = vmatpush1.bf16.msra.mxu1 %v2631_v34 }
  0x6c   :  { %1366 = vmatprep.subr.bf16.mxu0 %v2636_v35  ;;  %1407 = vmatprep.subr.bf16.mxu1 %v2639_v36 }
  0x6f   :  { %1367 = vmatpush2.bf16.msra.mxu0 %v2634_v37  ;;  %1408 = vmatpush2.bf16.msra.mxu1 %v2637_v38 }
  0x70   :  { %1368 = vmatprep.subr.bf16.mxu0 %v2642_v39  ;;  %1409 = vmatprep.subr.bf16.mxu1 %v2645_v40 }
  0x73   :  { %1369 = vmatpush2.bf16.msra.mxu0 %v2640_v41  ;;  %1410 = vmatpush2.bf16.msra.mxu1 %v2643_v42  ;;  %v2682_v41 = vld [vmem:[%s3657_s4 + $0xe8] ss:$16 sps:$4 sm:$0xff]  }
  0x74   :  { %1370 = vmatprep.subr.bf16.mxu0 %v2648_v43  ;;  %1411 = vmatprep.subr.bf16.mxu1 %v2651_v44  ;;  %v2685_v42 = vld [vmem:[%s3657_s4 + $0x2e8] ss:$16 sps:$4 sm:$0xff]   ;;  %v2690_v44 = vld [vmem:[%s3657_s4 + $0xcc] ss:$16 sps:$4 sm:$0xff]  }
  0x77   :  { %1371 = vmatpush2.bf16.msra.mxu0 %v2646_v45  ;;  %1412 = vmatpush2.bf16.msra.mxu1 %v2649_v46  ;;  %v2693_v45 = vld [vmem:[%s3657_s4 + $0x2cc] ss:$16 sps:$4 sm:$0xff]   ;;  %v2688_v46 = vld [vmem:[%s3657_s4 + $0xc8] ss:$16 sps:$4 sm:$0xff]  }
  0x78   :  { %1372 = vmatprep.subr.bf16.mxu0 %v2654_v47  ;;  %1413 = vmatprep.subr.bf16.mxu1 %v2657_v48  ;;  %v2691_v47 = vld [vmem:[%s3657_s4 + $0x2c8] ss:$16 sps:$4 sm:$0xff]   ;;  %v2696_v48 = vld [vmem:[%s3657_s4 + $0xac] ss:$16 sps:$4 sm:$0xff]  }
  0x7b   :  { %1373 = vmatpush2.bf16.msra.mxu0 %v2652_v49  ;;  %1414 = vmatpush2.bf16.msra.mxu1 %v2655_v50  ;;  %v2699_v49 = vld [vmem:[%s3657_s4 + $0x2ac] ss:$16 sps:$4 sm:$0xff]   ;;  %v2694_v50 = vld [vmem:[%s3657_s4 + $0xa8] ss:$16 sps:$4 sm:$0xff]  }
  0x7c   :  { %1374 = vmatprep.subr.bf16.mxu0 %v2660_v51  ;;  %1415 = vmatprep.subr.bf16.mxu1 %v2663_v52  ;;  %v2697_v51 = vld [vmem:[%s3657_s4 + $0x2a8] ss:$16 sps:$4 sm:$0xff]   ;;  %v2702_v52 = vld [vmem:[%s3657_s4 + $0x8c] ss:$16 sps:$4 sm:$0xff]  }
  0x7f   :  { %1375 = vmatpush2.bf16.msra.mxu0 %v2658_v53  ;;  %1416 = vmatpush2.bf16.msra.mxu1 %v2661_v54  ;;  %v2705_v53 = vld [vmem:[%s3657_s4 + $0x28c] ss:$16 sps:$4 sm:$0xff]   ;;  %v2700_v54 = vld [vmem:[%s3657_s4 + $0x88] ss:$16 sps:$4 sm:$0xff]  }
  0x80   :  { %1376 = vmatprep.subr.bf16.mxu0 %v2666_v55  ;;  %1417 = vmatprep.subr.bf16.mxu1 %v2669_v56  ;;  %v2703_v55 = vld [vmem:[%s3657_s4 + $0x288] ss:$16 sps:$4 sm:$0xff]   ;;  %v2708_v56 = vld [vmem:[%s3657_s4 + $0x6c] ss:$16 sps:$4 sm:$0xff]  }
  0x83   :  { %1377 = vmatpush2.bf16.msra.mxu0 %v2664_v57  ;;  %1418 = vmatpush2.bf16.msra.mxu1 %v2667_v58  ;;  %v2711_v57 = vld [vmem:[%s3657_s4 + $0x26c] ss:$16 sps:$4 sm:$0xff]   ;;  %v2706_v58 = vld [vmem:[%s3657_s4 + $0x68] ss:$16 sps:$4 sm:$0xff]  }
  0x84   :  { %1378 = vmatprep.subr.bf16.mxu0 %v2672_v59  ;;  %1419 = vmatprep.subr.bf16.mxu1 %v2675_v60  ;;  %v2709_v59 = vld [vmem:[%s3657_s4 + $0x268] ss:$16 sps:$4 sm:$0xff]   ;;  %v2714_v60 = vld [vmem:[%s3657_s4 + $0x4c] ss:$16 sps:$4 sm:$0xff]  }
  0x87   :  { %1379 = vmatpush2.bf16.msra.mxu0 %v2670_v61  ;;  %1420 = vmatpush2.bf16.msra.mxu1 %v2673_v62  ;;  %v2717_v61 = vld [vmem:[%s3657_s4 + $0x24c] ss:$16 sps:$4 sm:$0xff]   ;;  %v2712_v62 = vld [vmem:[%s3657_s4 + $0x48] ss:$16 sps:$4 sm:$0xff]  }
  0x88   :  { %1380 = vmatprep.subr.bf16.mxu0 %v2678_v63  ;;  %1421 = vmatprep.subr.bf16.mxu1 %v2681_v0  ;;  %v2715_v63 = vld [vmem:[%s3657_s4 + $0x248] ss:$16 sps:$4 sm:$0xff]   ;;  %v2720_v0 = vld [vmem:[%s3657_s4 + $0x2c] ss:$16 sps:$4 sm:$0xff]  }
  0x8b   :  { %1381 = vmatpush2.bf16.msra.mxu0 %v2676_v1  ;;  %1422 = vmatpush2.bf16.msra.mxu1 %v2679_v2  ;;  %v2723_v1 = vld [vmem:[%s3657_s4 + $0x22c] ss:$16 sps:$4 sm:$0xff]   ;;  %v2718_v2 = vld [vmem:[%s3657_s4 + $0x28] ss:$16 sps:$4 sm:$0xff]  }
  0x8c   :  { %1432 = vmatprep.subr.bf16.mxu0 %v2684_v3  ;;  %1473 = vmatprep.subr.bf16.mxu1 %v2687_v4  ;;  %v2721_v3 = vld [vmem:[%s3657_s4 + $0x228] ss:$16 sps:$4 sm:$0xff]   ;;  %v2726_v4 = vld [vmem:[%s3657_s4 + $0xc] ss:$16 sps:$4 sm:$0xff]  }
 0x10e   :  { %v498_v19 = vpop.f32.mrf.mxu0  ;;  %v539_v21 = vpop.f32.mrf.mxu1 }
 0x10f   :  { %v499_v22 = vadd.f32 %v498_v19, %v120_v13  ;;  %v540_v23 = vadd.f32 %v539_v21, %v128_v15  ;;  %v2732_v13 = vld [vmem:[%s3657_s4 + $0x1ec] ss:$16 sps:$4 sm:$0xff]   ;;  %v2730_v15 = vld [vmem:[%s3657_s4 + $0x1e8] ss:$16 sps:$4 sm:$0xff]  }
 0x110   :  { %v500_v26 = vpop.f32.mrf.mxu0  ;;  %v541_v27 = vpop.f32.mrf.mxu1  ;;  %v2736_v19 = vld [vmem:[%s3657_s4 + $0x1c8] ss:$16 sps:$4 sm:$0xff]   ;;  %v2744_v21 = vld [vmem:[%s3657_s4 + $0x1ac] ss:$16 sps:$4 sm:$0xff]  }
 0x111   :  { %v554_v28 = vmul.f32 %v550_v16, %v540_v23  ;;  %v501_v29 = vadd.f32 %v500_v26, %v124_v17  ;;  %v542_v30 = vadd.f32 %v541_v27, %v132_v18  ;;  %v552_v31 = vmul.f32 %v548_v20, %v499_v22  ;;  %v2733_v16 = vld [vmem:[%s3657_s4 + $0x3e8] ss:$16 sps:$4 sm:$0xff]   ;;  %v2738_v17 = vld [vmem:[%s3657_s4 + $0x1cc] ss:$16 sps:$4 sm:$0xff]  }
 0x112   :  { %v502_v32 = vpop.f32.mrf.mxu0  ;;  %v543_v33 = vpop.f32.mrf.mxu1  ;;  %v2741_v18 = vld [vmem:[%s3657_s4 + $0x3cc] ss:$16 sps:$4 sm:$0xff]   ;;  %v2739_v20 = vld [vmem:[%s3657_s4 + $0x3c8] ss:$16 sps:$4 sm:$0xff]  }
 0x113   :  { %v553_v34 = vmul.f32 %v549_v24, %v501_v29  ;;  %v555_v35 = vmul.f32 %v551_v25, %v542_v30  ;;  %v3391_v36 = vpack.c.bf16 %v554_v28, %v554_v28  ;;  %v3399_v43 = vpack.c.bf16 %v552_v31, %v552_v31  ;;  %v2747_v22 = vld [vmem:[%s3657_s4 + $0x3ac] ss:$16 sps:$4 sm:$0xff]   ;;  %v2742_v23 = vld [vmem:[%s3657_s4 + $0x1a8] ss:$16 sps:$4 sm:$0xff]  }
 0x114   :  { %v503_v37 = vpop.f32.mrf.mxu0  ;;  %v544_v38 = vpop.f32.mrf.mxu1  ;;  %v2745_v24 = vld [vmem:[%s3657_s4 + $0x3a8] ss:$16 sps:$4 sm:$0xff]   ;;  %v2750_v25 = vld [vmem:[%s3657_s4 + $0x18c] ss:$16 sps:$4 sm:$0xff]  }
 0x115   :  { %v557_v39 = vpack.c.bf16 %v553_v34, %v553_v34  ;;  %v559_v40 = vpack.c.bf16 %v555_v35, %v555_v35  ;;  %v2753_v26 = vld [vmem:[%s3657_s4 + $0x38c] ss:$16 sps:$4 sm:$0xff]   ;;  %v2748_v27 = vld [vmem:[%s3657_s4 + $0x188] ss:$16 sps:$4 sm:$0xff]  }
 0x116   :  { %v2751_v28 = vld [vmem:[%s3657_s4 + $0x388] ss:$16 sps:$4 sm:$0xff]   ;;  %v2756_v29 = vld [vmem:[%s3657_s4 + $0x16c] ss:$16 sps:$4 sm:$0xff]  }
 0x117   :  { %1382 = vmatprep.mubr.bf16.mxu0 %v557_v39  ;;  %1423 = vmatprep.mubr.bf16.mxu1 %v559_v40  ;;  %v2759_v30 = vld [vmem:[%s3657_s4 + $0x36c] ss:$16 sps:$4 sm:$0xff]   ;;  %v2754_v31 = vld [vmem:[%s3657_s4 + $0x168] ss:$16 sps:$4 sm:$0xff]  }
 0x118   :  { %1383 = vmatmul.mubr.bf16.vlgmr.msra.gmra.mxu0 %v3399_v43  ;;  %1424 = vmatmul.mubr.bf16.vlgmr.msra.gmra.mxu1 %v3391_v36  ;;  %v2757_v32 = vld [vmem:[%s3657_s4 + $0x368] ss:$16 sps:$4 sm:$0xff]   ;;  %v2762_v33 = vld [vmem:[%s3657_s4 + $0x14c] ss:$16 sps:$4 sm:$0xff]  }
 0x119   :  { %1433 = vmatpush1.bf16.msra.mxu0 %v2682_v41  ;;  %1474 = vmatpush1.bf16.msra.mxu1 %v2685_v42  ;;  %v2765_v34 = vld [vmem:[%s3657_s4 + $0x34c] ss:$16 sps:$4 sm:$0xff]   ;;  %v2760_v35 = vld [vmem:[%s3657_s4 + $0x148] ss:$16 sps:$4 sm:$0xff]  }
 0x11a   :  { %1464 = vmatprep.mubr.bf16.mxu0 %v557_v39  ;;  %1505 = vmatprep.mubr.bf16.mxu1 %v559_v40  ;;  %v2763_v37 = vld [vmem:[%s3657_s4 + $0x348] ss:$16 sps:$4 sm:$0xff]   ;;  %v2768_v38 = vld [vmem:[%s3657_s4 + $0x12c] ss:$16 sps:$4 sm:$0xff]  }
 0x11b   :  { %1434 = vmatprep.subr.bf16.mxu0 %v2690_v44  ;;  %1475 = vmatprep.subr.bf16.mxu1 %v2693_v45  ;;  %v2771_v39 = vld [vmem:[%s3657_s4 + $0x32c] ss:$16 sps:$4 sm:$0xff]   ;;  %v2766_v40 = vld [vmem:[%s3657_s4 + $0x128] ss:$16 sps:$4 sm:$0xff]  }
 0x11c   :  { %v2769_v41 = vld [vmem:[%s3657_s4 + $0x328] ss:$16 sps:$4 sm:$0xff]   ;;  %v2774_v42 = vld [vmem:[%s3657_s4 + $0x10c] ss:$16 sps:$4 sm:$0xff]  }
 0x11d   :  { %1435 = vmatpush1.bf16.msra.mxu0 %v2688_v46  ;;  %1476 = vmatpush1.bf16.msra.mxu1 %v2691_v47  ;;  %v2777_v44 = vld [vmem:[%s3657_s4 + $0x30c] ss:$16 sps:$4 sm:$0xff]   ;;  %v2772_v45 = vld [vmem:[%s3657_s4 + $0x108] ss:$16 sps:$4 sm:$0xff]  }
 0x11e   :  { %1436 = vmatprep.subr.bf16.mxu0 %v2696_v48  ;;  %1477 = vmatprep.subr.bf16.mxu1 %v2699_v49  ;;  %v2775_v46 = vld [vmem:[%s3657_s4 + $0x308] ss:$16 sps:$4 sm:$0xff]   ;;  %v2780_v47 = vld [vmem:[#allocation2 + $0x74] ss:$8 sps:$4 sm:$0xff]   ;;  %v2783_v49 = vld [vmem:[#allocation2 + $0x64] ss:$8 sps:$4 sm:$0xff]  }
 0x11f   :  { %v2778_v48 = vld [vmem:[#allocation2 + $0x70] ss:$8 sps:$4 sm:$0xff]  }
 0x121   :  { %1437 = vmatpush1.bf16.msra.mxu0 %v2694_v50  ;;  %1478 = vmatpush1.bf16.msra.mxu1 %v2697_v51  ;;  %v2781_v50 = vld [vmem:[#allocation2 + $0x60] ss:$8 sps:$4 sm:$0xff]   ;;  %v2786_v51 = vld [vmem:[#allocation2 + $0x54] ss:$8 sps:$4 sm:$0xff]  }
 0x122   :  { %1438 = vmatprep.subr.bf16.mxu0 %v2702_v52  ;;  %1479 = vmatprep.subr.bf16.mxu1 %v2705_v53  ;;  %v2784_v52 = vld [vmem:[#allocation2 + $0x50] ss:$8 sps:$4 sm:$0xff]   ;;  %v2789_v53 = vld [vmem:[#allocation2 + $0x44] ss:$8 sps:$4 sm:$0xff]  }
 0x125   :  { %1439 = vmatpush1.bf16.msra.mxu0 %v2700_v54  ;;  %1480 = vmatpush1.bf16.msra.mxu1 %v2703_v55  ;;  %v2787_v54 = vld [vmem:[#allocation2 + $0x40] ss:$8 sps:$4 sm:$0xff]   ;;  %v2792_v55 = vld [vmem:[#allocation2 + $0x34] ss:$8 sps:$4 sm:$0xff]  }
 0x126   :  { %1440 = vmatprep.subr.bf16.mxu0 %v2708_v56  ;;  %1481 = vmatprep.subr.bf16.mxu1 %v2711_v57  ;;  %v2828_v56 = vld [vmem:[#allocation2 + $0x174] ss:$8 sps:$4 sm:$0xff]   ;;  %v2790_v57 = vld [vmem:[#allocation2 + $0x30] ss:$8 sps:$4 sm:$0xff]  }
 0x129   :  { %1441 = vmatpush1.bf16.msra.mxu0 %v2706_v58  ;;  %1482 = vmatpush1.bf16.msra.mxu1 %v2709_v59  ;;  %v2826_v58 = vld [vmem:[#allocation2 + $0x170] ss:$8 sps:$4 sm:$0xff]   ;;  %v2829_v59 = vld [vmem:[#allocation2 + $0x160] ss:$8 sps:$4 sm:$0xff]  }
 0x12a   :  { %1442 = vmatprep.subr.bf16.mxu0 %v2714_v60  ;;  %1483 = vmatprep.subr.bf16.mxu1 %v2717_v61  ;;  %v2834_v60 = vld [vmem:[#allocation2 + $0x154] ss:$8 sps:$4 sm:$0xff]   ;;  %v2793_v61 = vld [vmem:[#allocation2 + $0x20] ss:$8 sps:$4 sm:$0xff]  }
 0x12d   :  { %1443 = vmatpush1.bf16.msra.mxu0 %v2712_v62  ;;  %1484 = vmatpush1.bf16.msra.mxu1 %v2715_v63  ;;  %v2798_v62 = vld [vmem:[#allocation2 + $0x14] ss:$8 sps:$4 sm:$0xff]   ;;  %v2832_v63 = vld [vmem:[#allocation2 + $0x150] ss:$8 sps:$4 sm:$0xff]  }
 0x12e   :  { %1444 = vmatprep.subr.bf16.mxu0 %v2720_v0  ;;  %1485 = vmatprep.subr.bf16.mxu1 %v2723_v1  ;;  %v2837_v0 = vld [vmem:[#allocation2 + $0x144] ss:$8 sps:$4 sm:$0xff]   ;;  %v2796_v1 = vld [vmem:[#allocation2 + $0x10] ss:$8 sps:$4 sm:$0xff]  }
 0x131   :  { %1445 = vmatpush1.bf16.msra.mxu0 %v2718_v2  ;;  %1486 = vmatpush1.bf16.msra.mxu1 %v2721_v3  ;;  %v2801_v2 = vld [vmem:[#allocation2 + $0x4] ss:$8 sps:$4 sm:$0xff]   ;;  %v2835_v3 = vld [vmem:[#allocation2 + $0x140] ss:$8 sps:$4 sm:$0xff]  }
 0x132   :  { %1446 = vmatprep.subr.bf16.mxu0 %v2726_v4  ;;  %1487 = vmatprep.subr.bf16.mxu1 %v2729_v5  ;;  %v2840_v4 = vld [vmem:[#allocation2 + $0x134] ss:$8 sps:$4 sm:$0xff]   ;;  %v2799_v5 = vld [vmem:[#allocation2] ss:$8 sps:$4 sm:$0xff]  }
 0x135   :  { %1447 = vmatpush1.bf16.msra.mxu0 %v2724_v9  ;;  %1488 = vmatpush1.bf16.msra.mxu1 %v2727_v12  ;;  %v2804_v9 = vld [vmem:[#allocation2 + $0xf4] ss:$8 sps:$4 sm:$0xff]   ;;  %v2838_v12 = vld [vmem:[#allocation2 + $0x130] ss:$8 sps:$4 sm:$0xff]  }
 0x136   :  { %1448 = vmatprep.subr.bf16.mxu0 %v2732_v13  ;;  %1489 = vmatprep.subr.bf16.mxu1 %v2735_v14  ;;  %v2843_v13 = vld [vmem:[#allocation2 + $0x124] ss:$8 sps:$4 sm:$0xff]   ;;  %v2802_v14 = vld [vmem:[#allocation2 + $0xf0] ss:$8 sps:$4 sm:$0xff]  }
 0x139   :  { %1449 = vmatpush2.bf16.msra.mxu0 %v2730_v15  ;;  %1490 = vmatpush2.bf16.msra.mxu1 %v2733_v16  ;;  %v2807_v15 = vld [vmem:[#allocation2 + $0xe4] ss:$8 sps:$4 sm:$0xff]   ;;  %v2841_v16 = vld [vmem:[#allocation2 + $0x120] ss:$8 sps:$4 sm:$0xff]  }
 0x13a   :  { %1450 = vmatprep.subr.bf16.mxu0 %v2738_v17  ;;  %1491 = vmatprep.subr.bf16.mxu1 %v2741_v18  ;;  %v2846_v17 = vld [vmem:[#allocation2 + $0x114] ss:$8 sps:$4 sm:$0xff]   ;;  %v2805_v18 = vld [vmem:[#allocation2 + $0xe0] ss:$8 sps:$4 sm:$0xff]  }
 0x13d   :  { %1451 = vmatpush2.bf16.msra.mxu0 %v2736_v19  ;;  %1492 = vmatpush2.bf16.msra.mxu1 %v2739_v20  ;;  %v2810_v19 = vld [vmem:[#allocation2 + $0xd4] ss:$8 sps:$4 sm:$0xff]   ;;  %v2844_v20 = vld [vmem:[#allocation2 + $0x110] ss:$8 sps:$4 sm:$0xff]  }
 0x13e   :  { %1452 = vmatprep.subr.bf16.mxu0 %v2744_v21  ;;  %1493 = vmatprep.subr.bf16.mxu1 %v2747_v22  ;;  %v2849_v21 = vld [vmem:[#allocation2 + $0x104] ss:$8 sps:$4 sm:$0xff]   ;;  %v2808_v22 = vld [vmem:[#allocation2 + $0xd0] ss:$8 sps:$4 sm:$0xff]  }
 0x141   :  { %1453 = vmatpush2.bf16.msra.mxu0 %v2742_v23  ;;  %1494 = vmatpush2.bf16.msra.mxu1 %v2745_v24  ;;  %v2813_v23 = vld [vmem:[#allocation2 + $0xc4] ss:$8 sps:$4 sm:$0xff]   ;;  %v2847_v24 = vld [vmem:[#allocation2 + $0x100] ss:$8 sps:$4 sm:$0xff]  }
 0x142   :  { %1454 = vmatprep.subr.bf16.mxu0 %v2750_v25  ;;  %1495 = vmatprep.subr.bf16.mxu1 %v2753_v26  ;;  %v2852_v25 = vld [vmem:[#allocation2 + $0x1f4] ss:$8 sps:$4 sm:$0xff]   ;;  %v2811_v26 = vld [vmem:[#allocation2 + $0xc0] ss:$8 sps:$4 sm:$0xff]  }
 0x145   :  { %1455 = vmatpush2.bf16.msra.mxu0 %v2748_v27  ;;  %1496 = vmatpush2.bf16.msra.mxu1 %v2751_v28  ;;  %v2816_v27 = vld [vmem:[#allocation2 + $0xb4] ss:$8 sps:$4 sm:$0xff]   ;;  %v2850_v28 = vld [vmem:[#allocation2 + $0x1f0] ss:$8 sps:$4 sm:$0xff]  }
 0x146   :  { %1456 = vmatprep.subr.bf16.mxu0 %v2756_v29  ;;  %1497 = vmatprep.subr.bf16.mxu1 %v2759_v30  ;;  %v2855_v29 = vld [vmem:[#allocation2 + $0x1e4] ss:$8 sps:$4 sm:$0xff]   ;;  %v2814_v30 = vld [vmem:[#allocation2 + $0xb0] ss:$8 sps:$4 sm:$0xff]  }
 0x149   :  { %1457 = vmatpush2.bf16.msra.mxu0 %v2754_v31  ;;  %1498 = vmatpush2.bf16.msra.mxu1 %v2757_v32  ;;  %v2819_v31 = vld [vmem:[#allocation2 + $0xa4] ss:$8 sps:$4 sm:$0xff]   ;;  %v2853_v32 = vld [vmem:[#allocation2 + $0x1e0] ss:$8 sps:$4 sm:$0xff]  }
 0x14a   :  { %1458 = vmatprep.subr.bf16.mxu0 %v2762_v33  ;;  %1499 = vmatprep.subr.bf16.mxu1 %v2765_v34  ;;  %v2858_v33 = vld [vmem:[#allocation2 + $0x1d4] ss:$8 sps:$4 sm:$0xff]   ;;  %v2817_v34 = vld [vmem:[#allocation2 + $0xa0] ss:$8 sps:$4 sm:$0xff]  }
 0x14d   :  { %1459 = vmatpush2.bf16.msra.mxu0 %v2760_v35  ;;  %1500 = vmatpush2.bf16.msra.mxu1 %v2763_v37  ;;  %v2822_v35 = vld [vmem:[#allocation2 + $0x94] ss:$8 sps:$4 sm:$0xff]   ;;  %v2856_v37 = vld [vmem:[#allocation2 + $0x1d0] ss:$8 sps:$4 sm:$0xff]  }
 0x14e   :  { %1460 = vmatprep.subr.bf16.mxu0 %v2768_v38  ;;  %1501 = vmatprep.subr.bf16.mxu1 %v2771_v39  ;;  %v2861_v38 = vld [vmem:[#allocation2 + $0x1c4] ss:$8 sps:$4 sm:$0xff]   ;;  %v2820_v39 = vld [vmem:[#allocation2 + $0x90] ss:$8 sps:$4 sm:$0xff]  }
 0x151   :  { %1461 = vmatpush2.bf16.msra.mxu0 %v2766_v40  ;;  %1502 = vmatpush2.bf16.msra.mxu1 %v2769_v41  ;;  %v2825_v40 = vld [vmem:[#allocation2 + $0x84] ss:$8 sps:$4 sm:$0xff]   ;;  %v2859_v41 = vld [vmem:[#allocation2 + $0x1c0] ss:$8 sps:$4 sm:$0xff]  }
 0x152   :  { %1462 = vmatprep.subr.bf16.mxu0 %v2774_v42  ;;  %1503 = vmatprep.subr.bf16.mxu1 %v2777_v44  ;;  %v2864_v42 = vld [vmem:[#allocation2 + $0x1b4] ss:$8 sps:$4 sm:$0xff]   ;;  %v2823_v44 = vld [vmem:[#allocation2 + $0x80] ss:$8 sps:$4 sm:$0xff]  }
 0x155   :  { %1463 = vmatpush2.bf16.msra.mxu0 %v2772_v45  ;;  %1504 = vmatpush2.bf16.msra.mxu1 %v2775_v46  ;;  %v2862_v45 = vld [vmem:[#allocation2 + $0x1b0] ss:$8 sps:$4 sm:$0xff]   ;;  %v2867_v46 = vld [vmem:[#allocation2 + $0x1a4] ss:$8 sps:$4 sm:$0xff]  }
 0x156   :  { %1922 = vmatprep.subr.bf16.mxu0 %v2780_v47  ;;  %1963 = vmatprep.subr.bf16.mxu1 %v2828_v56  ;;  %v2865_v47 = vld [vmem:[#allocation2 + $0x1a0] ss:$8 sps:$4 sm:$0xff]  }
 0x158   :  { %1465 = vmatmul.mubr.bf16.vlgmr.msra.gmra.mxu0 %v3399_v43  ;;  %1506 = vmatmul.mubr.bf16.vlgmr.msra.gmra.mxu1 %v3391_v36  ;;  %v2795_v43 = vld [vmem:[#allocation2 + $0x24] ss:$8 sps:$4 sm:$0xff]  }
 0x159   :  { %1923 = vmatpush1.bf16.msra.mxu0 %v2778_v48  ;;  %v2831_v36 = vld [vmem:[#allocation2 + $0x164] ss:$8 sps:$4 sm:$0xff]   ;;  %1964 = vmatpush1.bf16.msra.mxu1 %v2826_v58  ;;  %v2870_v48 = vld [vmem:[#allocation2 + $0x194] ss:$8 sps:$4 sm:$0xff]  }
 0x15a   :  { %1924 = vmatprep.subr.bf16.mxu0 %v2783_v49  ;;  %1965 = vmatprep.subr.bf16.mxu1 %v2831_v36  ;;  %v2868_v49 = vld [vmem:[#allocation2 + $0x190] ss:$8 sps:$4 sm:$0xff]  }
 0x15d   :  { %1925 = vmatpush1.bf16.msra.mxu0 %v2781_v50  ;;  %1966 = vmatpush1.bf16.msra.mxu1 %v2829_v59  ;;  %v2873_v50 = vld [vmem:[#allocation2 + $0x184] ss:$8 sps:$4 sm:$0xff]  }
 0x15e   :  { %1926 = vmatprep.subr.bf16.mxu0 %v2786_v51  ;;  %1967 = vmatprep.subr.bf16.mxu1 %v2834_v60  ;;  %v2871_v51 = vld [vmem:[#allocation2 + $0x180] ss:$8 sps:$4 sm:$0xff]  }
 0x161   :  { %1927 = vmatpush1.bf16.msra.mxu0 %v2784_v52  ;;  %1968 = vmatpush1.bf16.msra.mxu1 %v2832_v63  ;;  %v688_v52 = vld [vmem:[%s3658_s5] sm:$0xf] }
 0x162   :  { %1928 = vmatprep.subr.bf16.mxu0 %v2789_v53  ;;  %1969 = vmatprep.subr.bf16.mxu1 %v2837_v0  ;;  %v693_v53 = vrot.slane %v688_v52, %v3369_v7 }
 0x165   :  { %1929 = vmatpush1.bf16.msra.mxu0 %v2787_v54  ;;  %1970 = vmatpush1.bf16.msra.mxu1 %v2835_v3  ;;  %v697_v54 = vrot.slane %v688_v52, %v3376_v10 }
 0x166   :  { %1930 = vmatprep.subr.bf16.mxu0 %v2792_v55  ;;  %1971 = vmatprep.subr.bf16.mxu1 %v2840_v4 }
 0x169   :  { %1931 = vmatpush1.bf16.msra.mxu0 %v2790_v57  ;;  %1972 = vmatpush1.bf16.msra.mxu1 %v2838_v12  ;;  %v701_v12 = vrot.slane %v688_v52, %v127_v8 }
 0x16a   :  { %1932 = vmatprep.subr.bf16.mxu0 %v2795_v43  ;;  %1973 = vmatprep.subr.bf16.mxu1 %v2843_v13  ;;  %v705_v13 = vrot.slane %v688_v52, %v131_v11  ;;  %v2875_v11 = vld [vmem:[%s3661_s8 + $0x38] sm:$0xff]  }
 0x16d   :  { %1933 = vmatpush1.bf16.msra.mxu0 %v2793_v61  ;;  %1974 = vmatpush1.bf16.msra.mxu1 %v2841_v16 }
 0x16e   :  { %1934 = vmatprep.subr.bf16.mxu0 %v2798_v62  ;;  %1975 = vmatprep.subr.bf16.mxu1 %v2846_v17 }
 0x171   :  { %1935 = vmatpush1.bf16.msra.mxu0 %v2796_v1  ;;  %1976 = vmatpush1.bf16.msra.mxu1 %v2844_v20 }
 0x172   :  { %1936 = vmatprep.subr.bf16.mxu0 %v2801_v2  ;;  %1977 = vmatprep.subr.bf16.mxu1 %v2849_v21 }
 0x175   :  { %1937 = vmatpush1.bf16.msra.mxu0 %v2799_v5  ;;  %1978 = vmatpush1.bf16.msra.mxu1 %v2847_v24 }
 0x176   :  { %1938 = vmatprep.subr.bf16.mxu0 %v2804_v9  ;;  %1979 = vmatprep.subr.bf16.mxu1 %v2852_v25 }
 0x179   :  { %1939 = vmatpush2.bf16.msra.mxu0 %v2802_v14  ;;  %1980 = vmatpush2.bf16.msra.mxu1 %v2850_v28 }
 0x17a   :  { %1940 = vmatprep.subr.bf16.mxu0 %v2807_v15  ;;  %1981 = vmatprep.subr.bf16.mxu1 %v2855_v29 }
 0x17d   :  { %1941 = vmatpush2.bf16.msra.mxu0 %v2805_v18  ;;  %1982 = vmatpush2.bf16.msra.mxu1 %v2853_v32  ;;  %v2877_v32 = vld [vmem:[%s3661_s8 + $0x30] sm:$0xff]  }
 0x17e   :  { %1942 = vmatprep.subr.bf16.mxu0 %v2810_v19  ;;  %1983 = vmatprep.subr.bf16.mxu1 %v2858_v33  ;;  %v2878_v33 = vld [vmem:[%s3661_s8 + $0x68] sm:$0xff]  }
 0x181   :  { %1943 = vmatpush2.bf16.msra.mxu0 %v2808_v22  ;;  %1984 = vmatpush2.bf16.msra.mxu1 %v2856_v37  ;;  %v2881_v37 = vld [vmem:[%s3661_s8 + $0x20] sm:$0xff]  }
 0x182   :  { %1944 = vmatprep.subr.bf16.mxu0 %v2813_v23  ;;  %1985 = vmatprep.subr.bf16.mxu1 %v2861_v38  ;;  %v2882_v38 = vld [vmem:[%s3661_s8 + $0x58] sm:$0xff]  }
 0x185   :  { %1945 = vmatpush2.bf16.msra.mxu0 %v2811_v26  ;;  %1986 = vmatpush2.bf16.msra.mxu1 %v2859_v41  ;;  %v2885_v41 = vld [vmem:[%s3661_s8 + $0x10] sm:$0xff]  }
 0x186   :  { %1946 = vmatprep.subr.bf16.mxu0 %v2816_v27  ;;  %1987 = vmatprep.subr.bf16.mxu1 %v2864_v42  ;;  %v2886_v42 = vld [vmem:[%s3661_s8 + $0x48] sm:$0xff]  }
 0x189   :  { %1947 = vmatpush2.bf16.msra.mxu0 %v2814_v30  ;;  %1988 = vmatpush2.bf16.msra.mxu1 %v2862_v45  ;;  %v2888_v45 = vld [vmem:[%s3661_s8 + $0x40] sm:$0xff]  }
 0x18a   :  { %1948 = vmatprep.subr.bf16.mxu0 %v2819_v31  ;;  %1989 = vmatprep.subr.bf16.mxu1 %v2867_v46  ;;  %v2876_v31 = vld [vmem:[%s3661_s8 + $0x70] sm:$0xff]   ;;  %v2889_v46 = vld [vmem:[%s3661_s8] sm:$0xff]  }
 0x18d   :  { %1949 = vmatpush2.bf16.msra.mxu0 %v2817_v34  ;;  %1990 = vmatpush2.bf16.msra.mxu1 %v2865_v47  ;;  %v2879_v34 = vld [vmem:[%s3661_s8 + $0x28] sm:$0xff]  }
 0x18e   :  { %1950 = vmatprep.subr.bf16.mxu0 %v2822_v35  ;;  %1991 = vmatprep.subr.bf16.mxu1 %v2870_v48  ;;  %v2880_v35 = vld [vmem:[%s3661_s8 + $0x60] sm:$0xff]  }
 0x191   :  { %1951 = vmatpush2.bf16.msra.mxu0 %v2820_v39  ;;  %1992 = vmatpush2.bf16.msra.mxu1 %v2868_v49  ;;  %v2883_v39 = vld [vmem:[%s3661_s8 + $0x18] sm:$0xff]  }
 0x192   :  { %1952 = vmatprep.subr.bf16.mxu0 %v2825_v40  ;;  %1993 = vmatprep.subr.bf16.mxu1 %v2873_v50  ;;  %v2884_v40 = vld [vmem:[%s3661_s8 + $0x50] sm:$0xff]  }
 0x195   :  { %1953 = vmatpush2.bf16.msra.mxu0 %v2823_v44  ;;  %1994 = vmatpush2.bf16.msra.mxu1 %v2871_v51  ;;  %v2887_v44 = vld [vmem:[%s3661_s8 + $0x8] sm:$0xff]   ;;  %v1590_v51 = vld [vmem:[%s3660_s7] sm:$0x3] }
 0x196   :  { %2463 = vmatprep.subr.bf16.mxu0 %v2874_v6  ;;  %v1595_v52 = vrot.slane %v1590_v51, %v3369_v7 }
 0x1d8   :  { %v1384_v55 = vpop.f32.mrf.mxu0  ;;  %v1425_v56 = vpop.f32.mrf.mxu1 }
 0x1d9   :  { %v1385_v57 = vadd.f32 %v1384_v55, %v693_v53  ;;  %v1599_v53 = vrot.slane %v1590_v51, %v3376_v10 }
 0x1da   :  { %v1386_v58 = vpop.f32.mrf.mxu0  ;;  %v1427_v43 = vpop.f32.mrf.mxu1 }
 0x1db   :  { %v1426_v36 = vadd.f32 %v1425_v56, %v1385_v57  ;;  %v1387_v59 = vadd.f32 %v1386_v58, %v697_v54 }
 0x1dc   :  { %v1388_v60 = vpop.f32.mrf.mxu0  ;;  %v1429_v61 = vpop.f32.mrf.mxu1 }
 0x1dd   :  { %v1514_v62 = vmul.f32 0.01, %v1426_v36  ;;  %v1428_v63 = vadd.f32 %v1427_v43, %v1387_v59 }
 0x1de   :  { %v1389_v0 = vpop.f32.mrf.mxu0  ;;  %v1430_v1 = vpop.f32.mrf.mxu1 }
 0x1df   :  { %v1515_v2 = vmul.f32 0.01, %v1428_v63  ;;  %v1518_v3 = vmax.f32 %v1426_v36, %v1514_v62 }
 0x1e1   :  { %v1519_v4 = vmax.f32 %v1428_v63, %v1515_v2  ;;  %v1522_v9 = vpack.c.bf16 %v1518_v3, %v1518_v3  ;;  %v2446_v63 = vld [vmem:[%s3662_s9] ss:$0 sm:$0xff] }
 0x1e3   :  { %v1523_v5 = vpack.c.bf16 %v1519_v4, %v1519_v4 }
 0x1e5   :  { %1954 = vmatprep.mubr.bf16.mxu0 %v1523_v5 }
 0x1e6   :  { %1955 = vmatmul.mubr.bf16.vlgmr.msra.gmra.mxu0 %v1522_v9 }
 0x1e7   :  { %2464 = vmatpush3.bf16.msra.mxu0 %v2875_v11 }
 0x1e8   :  { %2465 = vmatprep.subr.bf16.mxu0 %v2876_v31 }
 0x1eb   :  { %2466 = vmatpush3.bf16.msra.mxu0 %v2877_v32 }
 0x1ec   :  { %2467 = vmatprep.subr.bf16.mxu0 %v2878_v33 }
 0x1ef   :  { %2468 = vmatpush3.bf16.msra.mxu0 %v2879_v34 }
 0x1f0   :  { %2469 = vmatprep.subr.bf16.mxu0 %v2880_v35 }
 0x1f3   :  { %2470 = vmatpush3.bf16.msra.mxu0 %v2881_v37 }
 0x1f4   :  { %2471 = vmatprep.subr.bf16.mxu0 %v2882_v38 }
 0x1f7   :  { %2472 = vmatpush3.bf16.msra.mxu0 %v2883_v39 }
 0x1f8   :  { %2473 = vmatprep.subr.bf16.mxu0 %v2884_v40 }
 0x1fb   :  { %2474 = vmatpush3.bf16.msra.mxu0 %v2885_v41 }
 0x1fc   :  { %2475 = vmatprep.subr.bf16.mxu0 %v2886_v42 }
 0x1ff   :  { %2476 = vmatpush3.bf16.msra.mxu0 %v2887_v44 }
 0x200   :  { %2477 = vmatprep.subr.bf16.mxu0 %v2888_v45 }
 0x203   :  { %2478 = vmatpush3.bf16.msra.mxu0 %v2889_v46 }
 0x218   :  { %v1466_v14 = vpop.f32.mrf.mxu0  ;;  %v1507_v15 = vpop.f32.mrf.mxu1 }
 0x219   :  { %v1467_v16 = vadd.f32 %v1466_v14, %v701_v12 }
 0x21a   :  { %v1468_v17 = vpop.f32.mrf.mxu0  ;;  %v1509_v18 = vpop.f32.mrf.mxu1 }
 0x21b   :  { %v1508_v19 = vadd.f32 %v1507_v15, %v1467_v16  ;;  %v1469_v20 = vadd.f32 %v1468_v17, %v705_v13 }
 0x21c   :  { %v1470_v21 = vpop.f32.mrf.mxu0  ;;  %v1511_v22 = vpop.f32.mrf.mxu1 }
 0x21d   :  { %v1516_v23 = vmul.f32 0.01, %v1508_v19  ;;  %v1510_v24 = vadd.f32 %v1509_v18, %v1469_v20 }
 0x21e   :  { %v1471_v25 = vpop.f32.mrf.mxu0  ;;  %v1512_v26 = vpop.f32.mrf.mxu1 }
 0x21f   :  { %v1517_v27 = vmul.f32 0.01, %v1510_v24  ;;  %v1520_v28 = vmax.f32 %v1508_v19, %v1516_v23 }
 0x221   :  { %v1521_v29 = vmax.f32 %v1510_v24, %v1517_v27  ;;  %v1524_v30 = vpack.c.bf16 %v1520_v28, %v1520_v28 }
 0x223   :  { %v1525_v8 = vpack.c.bf16 %v1521_v29, %v1521_v29 }
 0x225   :  { %1995 = vmatprep.mubr.bf16.mxu1 %v1525_v8 }
 0x226   :  { %1996 = vmatmul.mubr.bf16.vlgmr.msra.gmra.mxu1 %v1524_v30 }
 0x2a6   :  { %v1956_v47 = vpop.f32.mrf.mxu0 }
 0x2a7   :  { %v1957_v54 = vadd.f32 %v1956_v47, %v1595_v52 }
 0x2a8   :  { %v1958_v48 = vpop.f32.mrf.mxu0 }
 0x2a9   :  { %v1959_v56 = vadd.f32 %v1958_v48, %v1599_v53 }
 0x2aa   :  { %v1960_v49 = vpop.f32.mrf.mxu0 }
 0x2ac   :  { %v1961_v50 = vpop.f32.mrf.mxu0 }
 0x2e6   :  { %v1997_v55 = vpop.f32.mrf.mxu1 }
 0x2e7   :  { %v1998_v57 = vadd.f32 %v1997_v55, %v1957_v54 }
 0x2e8   :  { %v1999_v58 = vpop.f32.mrf.mxu1 }
 0x2e9   :  { %v2000_v43 = vadd.f32 %v1999_v58, %v1959_v56  ;;  %v2004_v60 = vpack.c.bf16 %v1998_v57, %v1998_v57 }
 0x2ea   :  { %v2001_v36 = vpop.f32.mrf.mxu1 }
 0x2eb   :  { %v2005_v59 = vpack.c.bf16 %v2000_v43, %v2000_v43 }
 0x2ec   :  { %v2002_v61 = vpop.f32.mrf.mxu1 }
 0x2ed   :  { %2173 = vmatprep.mubr.bf16.mxu0 %v2005_v59 }
 0x2ee   :  { %2174 = vmatmul.mubr.bf16.vlgmr.msra.gmra.mxu0 %v2004_v60 }
 0x3ae   :  { %v2479_v62 = vpop.f32.mrf.mxu0 }
 0x3b0   :  { %v2480_v7 = vpop.f32.mrf.mxu0 }
 0x3b1   :  { %v2481_v0 = vadd.f32 %v2480_v7, %v2479_v62 }
 0x3b2   :  { %v2482_v10 = vpop.f32.mrf.mxu0 }
 0x3b3   :  { %v2176_v1 = vadd.f32 %v2481_v0, %v2446_v63 }
 0x3b4   :  { %v2483_v2 = vpop.f32.mrf.mxu0 }
 0x3b5   :  { %v2181_v3 = vpack.c.bf16 %v2176_v1, %v2176_v1 }
 0x3b7   :  { %2182 = vst [vmem:[%s3663_s10] sm:$0xf] %v2181_v3 }
 0x3b8   :  { %2187 = vsyncpa [#allocation3], 1 }

</bundles_post_ra>
